<compile_context>
chip_gen: v7x
topology: tpu7x:2x2x1
jax: 0.10.0
libtpu: 0.0.40
codegen_flags: <defaults>
</compile_context>

<pallas_src>
import jax
import jax.numpy as jnp
from jax import lax
from jax.experimental import pallas as pl
from jax.experimental.pallas import tpu as pltpu


def _classifier_kernel(x_ref, w_ref, b_ref, o_ref):
    # x_ref: (TB, C, HW) f32/bf16 -- TB images, channel-major (free reshape of NCHW)
    # w_ref: (C, NC_PAD) bf16     -- 1x1-conv weight, resident across the grid
    # b_ref: (1, NC_PAD) f32      -- bias (lane-padded with zeros)
    # o_ref: (TB, NC_PAD) f32     -- per-image pooled logits
    tb, c, hw = x_ref.shape
    w = w_ref[...]                       # hoisted: read once per grid step
    b = b_ref[...]                       # (1, NC_PAD), broadcast once
    inv_hw = jnp.float32(1.0 / hw)

    if hw % 8 == 0:
        # Merged-M path: build (TB*HW, C) with per-image 2D XLU transposes
        # (sublane-aligned since HW % 8 == 0), then ONE MXU matmul with
        # M = TB*HW -- fills the 256-row MXU on v6e/v7x.
        parts = [jnp.transpose(x_ref[i], (1, 0)) for i in range(tb)]  # (HW, C) each
        x2d = jnp.concatenate(parts, axis=0).astype(jnp.bfloat16)     # (TB*HW, C)
        s = jnp.dot(x2d, w, preferred_element_type=jnp.float32)       # (TB*HW, NC_PAD)
        s = jnp.maximum(s + b, 0.0)                                   # bias + ReLU, f32
        # Tiny pooling epilogue: per-image sublane reduce + lane-dense row store.
        for i in range(tb):
            seg = s[i * hw:(i + 1) * hw, :]                           # static aligned slice
            o_ref[pl.ds(i, 1), :] = jnp.sum(seg, axis=0, keepdims=True) * inv_hw
    else:
        # Fallback (HW not a multiple of 8, e.g. 13x13=169): per-image
        # transposed-LHS matmuls; TB is capped small by the wrapper so the
        # static unroll stays cheap.
        x = x_ref[...].astype(jnp.bfloat16)                           # cast tile once
        for i in range(tb):
            si = lax.dot_general(
                x[i], w,
                dimension_numbers=(((0,), (0,)), ((), ())),           # contract over C
                preferred_element_type=jnp.float32)                   # (HW, NC_PAD)
            si = jnp.maximum(si + b, 0.0)
            o_ref[pl.ds(i, 1), :] = jnp.sum(si, axis=0, keepdims=True) * inv_hw


def _scoped_vmem_limit_bytes():
    """Generation-aware scoped-VMEM limit: min(physical / 2, 64 MiB)."""
    phys = None
    try:
        info = pltpu.get_tpu_info()
        phys = int(getattr(info, "vmem_capacity_bytes", 0)) or None
    except Exception:
        phys = None
    if not phys:
        phys = 64 << 20            # conservative default (v7x per-TC VMEM)
    return int(min(phys // 2, 64 << 20))


def _tile_footprint_bytes(tb, c, hw, nc_pad, x_itemsize):
    in_tile = tb * c * hw * x_itemsize       # input block (double-buffered)
    xt_f32 = tb * hw * c * 4                 # transposed merged operand (f32)
    x_bf16 = tb * hw * c * 2                 # bf16 MXU operand
    s_f32 = tb * hw * nc_pad * 4             # conv result (+ ReLU temp)
    out = tb * nc_pad * 4
    w_blk = c * nc_pad * 2                   # resident bf16 weight (double-buffered)
    b_blk = nc_pad * 4
    return 2 * in_tile + xt_f32 + x_bf16 + 2 * s_f32 + 2 * out + 2 * (w_blk + b_blk)


def _auto_tb(n, c, hw, nc_pad, x_itemsize, vmem_limit, max_tb):
    budget = int(0.7 * vmem_limit)
    divs = [d for d in range(1, n + 1) if n % d == 0 and d <= max_tb]
    fits = [d for d in divs
            if _tile_footprint_bytes(d, c, hw, nc_pad, x_itemsize) <= budget]
    if not fits:
        fits = [1]
    if n >= 2:
        # Prefer >= 2 grid steps: v7x megacore sharding + DMA/compute overlap.
        multi = [d for d in fits if n // d >= 2]
        if multi:
            return max(multi)
    return max(fits)


def squeezenet_classifier(x_nchw, weight, bias, *, tb=None):
    """Classifier head of SqueezeNetBase.

    x_nchw: (N, 512, H, W) feature map (output of `self.features`), f32 or bf16.
    weight: (n_classes, 512, 1, 1) 1x1-conv weight.
    bias:   (n_classes,).
    Returns (N, n_classes) float32 (== torch.flatten(classifier(x), 1)).
    """
    N, C, H, W = x_nchw.shape
    n_classes = weight.shape[0]
    HW = H * W
    NC_PAD = max(128, ((n_classes + 127) // 128) * 128)
    merged = (HW % 8 == 0)

    # Free reshape (merges contiguous trailing dims): NCHW -> (N, C, HW).
    x = x_nchw.reshape(N, C, HW)

    # (n_classes, 512, 1, 1) -> (C, NC_PAD) bf16 weight; (1, NC_PAD) f32 bias.
    # Zero-padded weight AND bias columns => ReLU(0)=0 in padded lanes.
    w = jnp.transpose(weight.reshape(n_classes, C), (1, 0))
    w = jnp.pad(w, ((0, 0), (0, NC_PAD - n_classes))).astype(jnp.bfloat16)
    b = jnp.pad(bias, (0, NC_PAD - n_classes)).reshape(1, NC_PAD).astype(jnp.float32)

    vmem_limit = _scoped_vmem_limit_bytes()
    if tb is None:
        # Fallback path statically unrolls per-image matmuls -> cap its TB.
        max_tb = N if merged else min(N, 8)
        tb = _auto_tb(N, C, HW, NC_PAD, x.dtype.itemsize, vmem_limit, max_tb)
    assert N % tb == 0, f"tb={tb} must divide batch N={N}"
    n_steps = N // tb

    cost = pl.CostEstimate(
        flops=2 * N * HW * C * NC_PAD,
        transcendentals=0,
        bytes_accessed=(x.size * x.dtype.itemsize
                        + w.size * w.dtype.itemsize
                        + b.size * b.dtype.itemsize
                        + N * NC_PAD * 4),
    )

    out = pl.pallas_call(
        _classifier_kernel,
        out_shape=jax.ShapeDtypeStruct((n_steps, tb, NC_PAD), jnp.float32),
        grid_spec=pltpu.PrefetchScalarGridSpec(
            num_scalar_prefetch=0,
            grid=(n_steps,),
            in_specs=[
                pl.BlockSpec((tb, C, HW), lambda n: (n, 0, 0)),
                pl.BlockSpec((C, NC_PAD), lambda n: (0, 0)),
                pl.BlockSpec((1, NC_PAD), lambda n: (0, 0)),
            ],
            out_specs=pl.BlockSpec((pl.Squeezed(), tb, NC_PAD),
                                   lambda n: (n, 0, 0)),
        ),
        compiler_params=pltpu.CompilerParams(
            dimension_semantics=("parallel",),
            vmem_limit_bytes=vmem_limit,
        ),
        cost_estimate=cost,
    )(x, w, b)

    # (n_steps, tb, NC_PAD) -> (N, NC_PAD) -> flatten(1) semantics -> (N, n_classes)
    return out.reshape(N, NC_PAD)[:, :n_classes]


def reference(x_nchw, weight, bias):
    """Pure-JAX f32 reference of the classifier head (inference mode)."""
    N, C, H, W = x_nchw.shape
    n_classes = weight.shape[0]
    w = weight.reshape(n_classes, C)
    s = jnp.einsum("nchw,kc->nkhw", x_nchw, w) + bias[None, :, None, None]
    s = jnp.maximum(s, 0.0)
    return jnp.mean(s, axis=(2, 3))


if __name__ == "__main__":
    key = jax.random.PRNGKey(0)
    k1, k2, k3 = jax.random.split(key, 3)

    def make_case(k, N, H, W, n_classes, C=512):
        kx, kw = jax.random.split(k)
        x = jax.random.normal(kx, (N, C, H, W), dtype=jnp.float32)
        std = (2.0 / C) ** 0.5                          # kaiming_normal, fan_in = C*1*1
        weight = jax.random.normal(kw, (n_classes, C, 1, 1), dtype=jnp.float32) * std
        bias = jnp.zeros((n_classes,), dtype=jnp.float32)
        return x, weight, bias

    # Case 1: small 8x8 feature map, 10 classes -> merged-M path.
    x, wgt, bia = make_case(k1, N=8, H=8, W=8, n_classes=10)
    ref = reference(x, wgt, bia)

    out = jax.block_until_ready(squeezenet_classifier(x, wgt, bia, tb=4))  # 2 grid steps
    assert out.shape == (8, 10), out.shape
    err = float(jnp.max(jnp.abs(out - ref)))
    assert jnp.allclose(out, ref, atol=2e-2, rtol=2e-2), err

    out_auto = jax.block_until_ready(squeezenet_classifier(x, wgt, bia))   # auto TB
    err_auto = float(jnp.max(jnp.abs(out_auto - ref)))
    assert jnp.allclose(out_auto, ref, atol=2e-2, rtol=2e-2), err_auto

    # Case 2: real SqueezeNet head geometry -- 13x13 spatial (HW=169, exercises
    # the non-multiple-of-8 fallback path) and 1000 classes (lane pad to 1024),
    # with a nonzero bias.
    x2, wgt2, _ = make_case(k2, N=4, H=13, W=13, n_classes=1000)
    bia2 = 0.1 * jax.random.normal(k3, (1000,), dtype=jnp.float32)
    ref2 = reference(x2, wgt2, bia2)
    out2 = jax.block_until_ready(squeezenet_classifier(x2, wgt2, bia2))
    assert out2.shape == (4, 1000), out2.shape
    err2 = float(jnp.max(jnp.abs(out2 - ref2)))
    assert jnp.allclose(out2, ref2, atol=2e-2, rtol=2e-2), err2

    print("KERNEL_OK")
</pallas_src>

<mosaic_0001>
module attributes {stable_mosaic.version = 11 : i64} {
  func.func @_classifier_kernel(%arg0: i32, %arg1: memref<4x512x64xf32, #tpu.memory_space<vmem>>, %arg2: memref<512x128xbf16, #tpu.memory_space<vmem>>, %arg3: memref<1x128xf32, #tpu.memory_space<vmem>>, %arg4: memref<1x4x128xf32, #tpu.memory_space<vmem>>) attributes {dimension_semantics = [#tpu.dimension_semantics<parallel>], iteration_bounds = array<i64: 2>, scalar_prefetch = 0 : i64, scratch_operands = 0 : i64, tpu.core_type = #tpu.core_type<tc>, window_params = [{transform_indices = @transform_0, window_bounds = array<i64: 4, 512, 64>}, {pipeline_mode = #tpu.pipeline_mode<synchronous>, transform_indices = @transform_1, window_bounds = array<i64: 512, 128>}, {pipeline_mode = #tpu.pipeline_mode<synchronous>, transform_indices = @transform_2, window_bounds = array<i64: 1, 128>}, {transform_indices = @transform_3, window_bounds = array<i64: 1, 4, 128>}]} {
    %c0 = arith.constant 0 : index
    %c0_0 = arith.constant 0 : index
    %0 = vector.load %arg2[%c0, %c0_0] : memref<512x128xbf16, #tpu.memory_space<vmem>>, vector<512x128xbf16>
    %c0_1 = arith.constant 0 : index
    %c0_2 = arith.constant 0 : index
    %1 = vector.load %arg3[%c0_1, %c0_2] : memref<1x128xf32, #tpu.memory_space<vmem>>, vector<1x128xf32>
    %c0_3 = arith.constant 0 : index
    %c0_4 = arith.constant 0 : index
    %c0_5 = arith.constant 0 : index
    %2 = vector.load %arg1[%c0_3, %c0_4, %c0_5] : memref<4x512x64xf32, #tpu.memory_space<vmem>>, vector<1x512x64xf32>
    %3 = vector.shape_cast %2 : vector<1x512x64xf32> to vector<512x64xf32>
    %4 = tpu.transpose %3, [1, 0] : vector<512x64xf32> -> vector<64x512xf32>
    %c1 = arith.constant 1 : index
    %c0_6 = arith.constant 0 : index
    %c0_7 = arith.constant 0 : index
    %5 = vector.load %arg1[%c1, %c0_6, %c0_7] : memref<4x512x64xf32, #tpu.memory_space<vmem>>, vector<1x512x64xf32>
    %6 = vector.shape_cast %5 : vector<1x512x64xf32> to vector<512x64xf32>
    %7 = tpu.transpose %6, [1, 0] : vector<512x64xf32> -> vector<64x512xf32>
    %c2 = arith.constant 2 : index
    %c0_8 = arith.constant 0 : index
    %c0_9 = arith.constant 0 : index
    %8 = vector.load %arg1[%c2, %c0_8, %c0_9] : memref<4x512x64xf32, #tpu.memory_space<vmem>>, vector<1x512x64xf32>
    %9 = vector.shape_cast %8 : vector<1x512x64xf32> to vector<512x64xf32>
    %10 = tpu.transpose %9, [1, 0] : vector<512x64xf32> -> vector<64x512xf32>
    %c3 = arith.constant 3 : index
    %c0_10 = arith.constant 0 : index
    %c0_11 = arith.constant 0 : index
    %11 = vector.load %arg1[%c3, %c0_10, %c0_11] : memref<4x512x64xf32, #tpu.memory_space<vmem>>, vector<1x512x64xf32>
    %12 = vector.shape_cast %11 : vector<1x512x64xf32> to vector<512x64xf32>
    %13 = tpu.transpose %12, [1, 0] : vector<512x64xf32> -> vector<64x512xf32>
    %14 = tpu.concatenate %4, %7, %10, %13 in 0 : vector<64x512xf32>, vector<64x512xf32>, vector<64x512xf32>, vector<64x512xf32> -> vector<256x512xf32>
    %15 = arith.truncf %14 : vector<256x512xf32> to vector<256x512xbf16>
    %cst = arith.constant dense<0.000000e+00> : vector<256x128xf32>
    %16 = tpu.matmul %15, %0, %cst {dimension_numbers = #tpu.dot_dimension_numbers<[1], [0], [0], [1], [0, 0, 1, 1], [], []>} : vector<256x512xbf16>, vector<512x128xbf16>, vector<256x128xf32> -> vector<256x128xf32>
    %17 = vector.broadcast %1 : vector<1x128xf32> to vector<256x128xf32>
    %18 = arith.addf %16, %17 : vector<256x128xf32>
    %cst_12 = arith.constant 0.000000e+00 : f32
    %19 = vector.broadcast %cst_12 : f32 to vector<256x128xf32>
    %20 = arith.maximumf %18, %19 : vector<256x128xf32>
    %21 = vector.extract_strided_slice %20 {offsets = [0, 0], sizes = [64, 128], strides = [1, 1]} : vector<256x128xf32> to vector<64x128xf32>
    %cst_13 = arith.constant dense<0.000000e+00> : vector<128xf32>
    %22 = vector.multi_reduction <add>, %21, %cst_13 [0] : vector<64x128xf32> to vector<128xf32>
    %23 = vector.shape_cast %22 : vector<128xf32> to vector<1x128xf32>
    %cst_14 = arith.constant 1.562500e-02 : f32
    %24 = vector.broadcast %cst_14 : f32 to vector<1x128xf32>
    %25 = arith.mulf %23, %24 : vector<1x128xf32>
    %c0_15 = arith.constant 0 : index
    %c0_16 = arith.constant 0 : index
    %c0_17 = arith.constant 0 : index
    %26 = vector.load %arg4[%c0_15, %c0_16, %c0_17] : memref<1x4x128xf32, #tpu.memory_space<vmem>>, vector<1x1x128xf32>
    %27 = vector.shape_cast %26 : vector<1x1x128xf32> to vector<1x128xf32>
    %28 = vector.shape_cast %25 : vector<1x128xf32> to vector<1x1x128xf32>
    tpu.vector_store %arg4[%c0_15, %c0_16, %c0_17], %28 {strides = array<i32>} : memref<1x4x128xf32, #tpu.memory_space<vmem>>, vector<1x1x128xf32>,
    %29 = vector.extract_strided_slice %20 {offsets = [64, 0], sizes = [64, 128], strides = [1, 1]} : vector<256x128xf32> to vector<64x128xf32>
    %cst_18 = arith.constant dense<0.000000e+00> : vector<128xf32>
    %30 = vector.multi_reduction <add>, %29, %cst_18 [0] : vector<64x128xf32> to vector<128xf32>
    %31 = vector.shape_cast %30 : vector<128xf32> to vector<1x128xf32>
    %cst_19 = arith.constant 1.562500e-02 : f32
    %32 = vector.broadcast %cst_19 : f32 to vector<1x128xf32>
    %33 = arith.mulf %31, %32 : vector<1x128xf32>
    %c0_20 = arith.constant 0 : index
    %c1_21 = arith.constant 1 : index
    %c0_22 = arith.constant 0 : index
    %34 = vector.load %arg4[%c0_20, %c1_21, %c0_22] : memref<1x4x128xf32, #tpu.memory_space<vmem>>, vector<1x1x128xf32>
    %35 = vector.shape_cast %34 : vector<1x1x128xf32> to vector<1x128xf32>
    %36 = vector.shape_cast %33 : vector<1x128xf32> to vector<1x1x128xf32>
    tpu.vector_store %arg4[%c0_20, %c1_21, %c0_22], %36 {strides = array<i32>} : memref<1x4x128xf32, #tpu.memory_space<vmem>>, vector<1x1x128xf32>,
    %37 = vector.extract_strided_slice %20 {offsets = [128, 0], sizes = [64, 128], strides = [1, 1]} : vector<256x128xf32> to vector<64x128xf32>
    %cst_23 = arith.constant dense<0.000000e+00> : vector<128xf32>
    %38 = vector.multi_reduction <add>, %37, %cst_23 [0] : vector<64x128xf32> to vector<128xf32>
    %39 = vector.shape_cast %38 : vector<128xf32> to vector<1x128xf32>
    %cst_24 = arith.constant 1.562500e-02 : f32
    %40 = vector.broadcast %cst_24 : f32 to vector<1x128xf32>
    %41 = arith.mulf %39, %40 : vector<1x128xf32>
    %c0_25 = arith.constant 0 : index
    %c2_26 = arith.constant 2 : index
    %c0_27 = arith.constant 0 : index
    %42 = vector.load %arg4[%c0_25, %c2_26, %c0_27] : memref<1x4x128xf32, #tpu.memory_space<vmem>>, vector<1x1x128xf32>
    %43 = vector.shape_cast %42 : vector<1x1x128xf32> to vector<1x128xf32>
    %44 = vector.shape_cast %41 : vector<1x128xf32> to vector<1x1x128xf32>
    tpu.vector_store %arg4[%c0_25, %c2_26, %c0_27], %44 {strides = array<i32>} : memref<1x4x128xf32, #tpu.memory_space<vmem>>, vector<1x1x128xf32>,
    %45 = vector.extract_strided_slice %20 {offsets = [192, 0], sizes = [64, 128], strides = [1, 1]} : vector<256x128xf32> to vector<64x128xf32>
    %cst_28 = arith.constant dense<0.000000e+00> : vector<128xf32>
    %46 = vector.multi_reduction <add>, %45, %cst_28 [0] : vector<64x128xf32> to vector<128xf32>
    %47 = vector.shape_cast %46 : vector<128xf32> to vector<1x128xf32>
    %cst_29 = arith.constant 1.562500e-02 : f32
    %48 = vector.broadcast %cst_29 : f32 to vector<1x128xf32>
    %49 = arith.mulf %47, %48 : vector<1x128xf32>
    %c0_30 = arith.constant 0 : index
    %c3_31 = arith.constant 3 : index
    %c0_32 = arith.constant 0 : index
    %50 = vector.load %arg4[%c0_30, %c3_31, %c0_32] : memref<1x4x128xf32, #tpu.memory_space<vmem>>, vector<1x1x128xf32>
    %51 = vector.shape_cast %50 : vector<1x1x128xf32> to vector<1x128xf32>
    %52 = vector.shape_cast %49 : vector<1x128xf32> to vector<1x1x128xf32>
    tpu.vector_store %arg4[%c0_30, %c3_31, %c0_32], %52 {strides = array<i32>} : memref<1x4x128xf32, #tpu.memory_space<vmem>>, vector<1x1x128xf32>,
    return
  }
  func.func @transform_0(%arg0: i32) -> (i32, i32, i32) {
    %c0_i32 = arith.constant 0 : i32
    %c0_i32_0 = arith.constant 0 : i32
    %c0_i32_1 = arith.constant 0 : i32
    return %arg0, %c0_i32, %c0_i32_0 : i32, i32, i32
  }
  func.func @transform_1(%arg0: i32) -> (i32, i32) {
    %c0_i32 = arith.constant 0 : i32
    %c0_i32_0 = arith.constant 0 : i32
    %c0_i32_1 = arith.constant 0 : i32
    return %c0_i32, %c0_i32_0 : i32, i32
  }
  func.func @transform_2(%arg0: i32) -> (i32, i32) {
    %c0_i32 = arith.constant 0 : i32
    %c0_i32_0 = arith.constant 0 : i32
    %c0_i32_1 = arith.constant 0 : i32
    return %c0_i32, %c0_i32_0 : i32, i32
  }
  func.func @transform_3(%arg0: i32) -> (i32, i32, i32) {
    %c0_i32 = arith.constant 0 : i32
    %c0_i32_0 = arith.constant 0 : i32
    %c0_i32_1 = arith.constant 0 : i32
    return %arg0, %c0_i32, %c0_i32_0 : i32, i32, i32
  }
}

</mosaic_0001>

<bundles_post_ra>
// kernel: tpu_custom_call.1
= control target key start
LH: loop header
LB: loop body
LE: loop exit
PB: predicated region body
PF: predicated region fallthrough
CT: control target
= control target key end

     0   :  { %8 = vsyncpa [#allocation3], 0  ;;  %s3455_s0 = inlined_call_operand.vmem [shape: f32[8,512,64], index: 0, kind: input, shape index: {}]   ;;  %s3456_s1 = inlined_call_operand.vmem [shape: bf16[512,128], index: 1, kind: input, shape index: {}]   ;;  %s3457_s2 = inlined_call_operand.vmem [shape: f32[1,128], index: 2, kind: input, shape index: {}]   ;;  %s3458_s3 = inlined_call_operand.hbm [shape: f32[2,4,128], index: 3, kind: output, shape index: {}]  }
   0x1   :  { %10 = vsyncpa [#allocation3 + $0x1], 0  ;;  %s2954_s12 = smov 0   ;;  %s2956_s13 = smov 0  }
   0x2   :  { %s2958_s14 = smov 0   ;;  %s2960_s15 = smov 0  }
   0x3 LB: > { %s2975_s16 = sadd.s32 4294967295, %s2931_s15   ;;  %s1760_s17 = sadd.s32 4294967294, %s2931_s15   ;;  %s2931_s15 = sphi %s2960_s15, %s3464_s15   ;;  %s2927_s14 = sphi %s2958_s14, %s3463_s14   ;;  %s2923_s13 = sphi %s2956_s13, %s3462_s13   ;;  %s2919_s12 = sphi %s2954_s12, %s3461_s12  }
   0x4   : > { %s2979_s18 = sadd.s32 1, %s2931_s15   ;;  %s91_s19 = sadd.s32 1, %s2927_s14 }
   0x5   : > { %s88_s20 = ssub.s32 %s2931_s15, %s2979_s18  ;;  %p101_p0 = scmp.ne.s32.totalorder %s2927_s14, %s2923_s13 }
   0x6   : > { %p89_p1 = scmp.eq.s32.totalorder %s88_s20, 0  ;;  %p102_p2 = scmp.eq.s32.totalorder %s2975_s16, 1 }
   0x7   : > { %p107_p3 = scmp.ne.s32.totalorder %s2923_s13, %s2919_s12  ;;  %p108_p4 = scmp.eq.s32.totalorder %s1760_s17, 1 }
   0x8   : > { %s2990_s21 = scalar_select %p89_p1, %s2927_s14, %s91_s19  }
   0x9   : > { %p2992_p5 = por %p102_p2, %p101_p0  ;;  %p2996_p6 = por %p108_p4, %p107_p3 }
   0xa   : > { %p1763_p7 = scmp.ge.s32.totalorder %s2931_s15, 1  ;;  %p142_p8 = scmp.lt.s32.totalorder %s2931_s15, 3 }
   0xc   : > { %p143_p9 = pnand %p1763_p7, %p142_p8 }
   0xd   : > { %s1765_s24 = sshll.u32 (!%p143_p9), %s2975_s16, 2  ;;  %s1994_s29 = sshll.u32 (!%p143_p9), %s2975_s16, 6 }
   0xe   : > { %146 = sbr.rel (%p143_p9) target bundleno = 637 (0x27d), region = 32  ;;  %p168_p10 = scmp.lt.s32.totalorder (!%p143_p9), %s1765_s24, 7 }
   0xf   : > { %s3410_s6 = scalar_lea.hbm (!%p143_p9), %s3458_s3, %s1994_s29  ;;  %s2933_s16 = smov (!%p143_p9), [#allocation2]  }
  0x10   : > { %s2873_s9 = sshll.u32 (!%p143_p9), %s2933_s16, 4  ;;  %s2874_s9 = int_to_ptr.vmem [resolvable:$false] %s2873_s9 }
  0x11   : > { %s2875_s10 = scalar_lea.vmem (!%p143_p9), %s2874_s9, 128 }
  0x15   : > { %s3466_s24 = smov (!%p168_p10, %s1765_s24), 7 }
  0x16   : > { %s1997_s25 = sshll.u32 %s3466_s24, 9 }
  0x17   : > { %s3006_s28 = scalar_lea.vmem %s3455_s0, %s1997_s25  ;;  %s164_s25 = sand.u32 1, %s2923_s13  }
  0x18   : > { %v272_v0 = vld [vmem:[%s3006_s28 + $0x100] sm:$0xff]  ;;  %v273_v5 = vld [vmem:[%s3006_s28 + $0x108] sm:$0xff]  ;;  %v274_v12 = vld [vmem:[%s3006_s28 + $0x110] sm:$0xff]  ;;  %s1764_s26 = sshll.u32 %s164_s25, 2  ;;  %s1688_s7 = scalar_lea.sflag [#allocation3], %s164_s25 }
  0x19   : > { %v288_v1 = vld [vmem:[%s3006_s28 + $0x180] sm:$0xff]  ;;  %v289_v6 = vld [vmem:[%s3006_s28 + $0x188] sm:$0xff]  ;;  %v290_v13 = vld [vmem:[%s3006_s28 + $0x190] sm:$0xff]  ;;  %s3376_s27 = scalar_lea.vmem [#allocation2], %s1764_s26 }
  0x1a   : > { %v240_v2 = vld [vmem:[%s3006_s28] sm:$0xff]  ;;  %v2333_v3 = vpack.i.bf16 %v288_v1, %v272_v0  ;;  %v241_v8 = vld [vmem:[%s3006_s28 + $0x8] sm:$0xff]  ;;  %v2335_v10 = vpack.i.bf16 %v289_v6, %v273_v5  ;;  %v242_v14 = vld [vmem:[%s3006_s28 + $0x10] sm:$0xff]  ;;  %v2337_v16 = vpack.i.bf16 %v290_v13, %v274_v12  ;;  %s1701_s30 = sshll.u32 %s3376_s27, 4  ;;  %s3412_s30 = int_to_ptr.vmem [resolvable:$true] %s1701_s30 }
  0x1b   : > { %v256_v4 = vld [vmem:[%s3006_s28 + $0x80] sm:$0xff]  ;;  %v257_v9 = vld [vmem:[%s3006_s28 + $0x88] sm:$0xff]  ;;  %v258_v15 = vld [vmem:[%s3006_s28 + $0x90] sm:$0xff]  ;;  %s2869_s8 = scalar_lea.vmem %s3412_s30, 64  ;;  %p2876_p0 = scmp.lt.s32.totalorder %s3412_s30, %s2874_s9 }
  0x1c   : > { %v2261_v7 = vpack.i.bf16 %v256_v4, %v240_v2  ;;  %2334 = vxpose.xlu1.b32.start [1/16] (narrow) %v2333_v3, 64  ;;  %v2263_v11 = vpack.i.bf16 %v257_v9, %v241_v8  ;;  %v2265_v17 = vpack.i.bf16 %v258_v15, %v242_v14  ;;  %v275_v18 = vld [vmem:[%s3006_s28 + $0x118] sm:$0xff]  ;;  %v276_v24 = vld [vmem:[%s3006_s28 + $0x120] sm:$0xff]  ;;  %v277_v30 = vld [vmem:[%s3006_s28 + $0x128] sm:$0xff]  ;;  %p2870_p11 = scmp.ne.s32.totalorder %s3412_s30, %s2869_s8  ;;  %p2877_p1 = scmp.lt.s32.totalorder %s2875_s10, %s2869_s8 }
  0x1d   : > { %v291_v19 = vld [vmem:[%s3006_s28 + $0x198] sm:$0xff]  ;;  %v292_v25 = vld [vmem:[%s3006_s28 + $0x1a0] sm:$0xff]  ;;  %v293_v31 = vld [vmem:[%s3006_s28 + $0x1a8] sm:$0xff] }
  0x1e   : > { %2262 = vxpose.xlu0.b32.start [1/16] (narrow) %v2261_v7, 64  ;;  %v243_v20 = vld [vmem:[%s3006_s28 + $0x18] sm:$0xff]  ;;  %v2339_v22 = vpack.i.bf16 %v291_v19, %v275_v18  ;;  %v244_v26 = vld [vmem:[%s3006_s28 + $0x20] sm:$0xff]  ;;  %v2341_v28 = vpack.i.bf16 %v292_v25, %v276_v24  ;;  %v245_v32 = vld [vmem:[%s3006_s28 + $0x28] sm:$0xff]  ;;  %v2343_v34 = vpack.i.bf16 %v293_v31, %v277_v30  ;;  %p2871_p12 = pnand %p2870_p11, %p2992_p5  ;;  %p2878_p2 = por %p2877_p1, %p2876_p0 }
  0x1f   : > { %v259_v21 = vld [vmem:[%s3006_s28 + $0x98] sm:$0xff]  ;;  %v260_v27 = vld [vmem:[%s3006_s28 + $0xa0] sm:$0xff]  ;;  %v261_v33 = vld [vmem:[%s3006_s28 + $0xa8] sm:$0xff] }
  0x20   : > { %2336 = vxpose.xlu1.b32.cont [2/16] (narrow) %v2335_v10, 64  ;;  %v2267_v23 = vpack.i.bf16 %v259_v21, %v243_v20  ;;  %v2269_v29 = vpack.i.bf16 %v260_v27, %v244_v26  ;;  %v2271_v35 = vpack.i.bf16 %v261_v33, %v245_v32  ;;  %v278_v36 = vld [vmem:[%s3006_s28 + $0x130] sm:$0xff]  ;;  %v279_v42 = vld [vmem:[%s3006_s28 + $0x138] sm:$0xff]  ;;  %v280_v48 = vld [vmem:[%s3006_s28 + $0x140] sm:$0xff]  ;;  %p2872_p13 = pneg %p2871_p12 }
  0x21   : > { %v294_v37 = vld [vmem:[%s3006_s28 + $0x1b0] sm:$0xff]  ;;  %v295_v43 = vld [vmem:[%s3006_s28 + $0x1b8] sm:$0xff]  ;;  %v296_v49 = vld [vmem:[%s3006_s28 + $0x1c0] sm:$0xff] }
  0x22   : > { %2264 = vxpose.xlu0.b32.cont [2/16] (narrow) %v2263_v11, 64  ;;  %v246_v38 = vld [vmem:[%s3006_s28 + $0x30] sm:$0xff]  ;;  %v2345_v40 = vpack.i.bf16 %v294_v37, %v278_v36  ;;  %v247_v44 = vld [vmem:[%s3006_s28 + $0x38] sm:$0xff]  ;;  %v2347_v46 = vpack.i.bf16 %v295_v43, %v279_v42  ;;  %v248_v50 = vld [vmem:[%s3006_s28 + $0x40] sm:$0xff]  ;;  %v2349_v52 = vpack.i.bf16 %v296_v49, %v280_v48  ;;  %p2879_p3 = pnand %p2878_p2, %p2872_p13 }
  0x23   : > { %v262_v39 = vld [vmem:[%s3006_s28 + $0xb0] sm:$0xff]  ;;  %v263_v45 = vld [vmem:[%s3006_s28 + $0xb8] sm:$0xff]  ;;  %v264_v51 = vld [vmem:[%s3006_s28 + $0xc0] sm:$0xff] }
  0x24   : > { %2338 = vxpose.xlu1.b32.cont [3/16] (narrow) %v2337_v16, 64  ;;  %v2273_v41 = vpack.i.bf16 %v262_v39, %v246_v38  ;;  %v2275_v47 = vpack.i.bf16 %v263_v45, %v247_v44  ;;  %v2277_v53 = vpack.i.bf16 %v264_v51, %v248_v50  ;;  %v281_v54 = vld [vmem:[%s3006_s28 + $0x148] sm:$0xff]  ;;  %v282_v60 = vld [vmem:[%s3006_s28 + $0x150] sm:$0xff]  ;;  %v283_v2 = vld [vmem:[%s3006_s28 + $0x158] sm:$0xff] }
  0x25   : > { %v297_v55 = vld [vmem:[%s3006_s28 + $0x1c8] sm:$0xff]  ;;  %v298_v61 = vld [vmem:[%s3006_s28 + $0x1d0] sm:$0xff]  ;;  %v299_v3 = vld [vmem:[%s3006_s28 + $0x1d8] sm:$0xff] }
  0x26   : > { %2266 = vxpose.xlu0.b32.cont [3/16] (narrow) %v2265_v17, 64  ;;  %v249_v56 = vld [vmem:[%s3006_s28 + $0x48] sm:$0xff]  ;;  %v2351_v58 = vpack.i.bf16 %v297_v55, %v281_v54  ;;  %v250_v62 = vld [vmem:[%s3006_s28 + $0x50] sm:$0xff]  ;;  %v2353_v0 = vpack.i.bf16 %v298_v61, %v282_v60  ;;  %v251_v4 = vld [vmem:[%s3006_s28 + $0x58] sm:$0xff]  ;;  %v2355_v6 = vpack.i.bf16 %v299_v3, %v283_v2 }
  0x27   : > { %v265_v57 = vld [vmem:[%s3006_s28 + $0xc8] sm:$0xff]  ;;  %v266_v63 = vld [vmem:[%s3006_s28 + $0xd0] sm:$0xff]  ;;  %v267_v5 = vld [vmem:[%s3006_s28 + $0xd8] sm:$0xff] }
  0x28   : > { %2340 = vxpose.xlu1.b32.cont [4/16] (narrow) %v2339_v22, 64  ;;  %v2279_v59 = vpack.i.bf16 %v265_v57, %v249_v56  ;;  %v2281_v1 = vpack.i.bf16 %v266_v63, %v250_v62  ;;  %v2283_v7 = vpack.i.bf16 %v267_v5, %v251_v4  ;;  %v284_v8 = vld [vmem:[%s3006_s28 + $0x160] sm:$0xff]  ;;  %v285_v14 = vld [vmem:[%s3006_s28 + $0x168] sm:$0xff]  ;;  %v286_v20 = vld [vmem:[%s3006_s28 + $0x170] sm:$0xff] }
  0x29   : > { %v300_v9 = vld [vmem:[%s3006_s28 + $0x1e0] sm:$0xff]  ;;  %v301_v15 = vld [vmem:[%s3006_s28 + $0x1e8] sm:$0xff]  ;;  %v302_v21 = vld [vmem:[%s3006_s28 + $0x1f0] sm:$0xff] }
  0x2a   : > { %2268 = vxpose.xlu0.b32.cont [4/16] (narrow) %v2267_v23, 64  ;;  %v252_v10 = vld [vmem:[%s3006_s28 + $0x60] sm:$0xff]  ;;  %v2357_v12 = vpack.i.bf16 %v300_v9, %v284_v8  ;;  %v253_v16 = vld [vmem:[%s3006_s28 + $0x68] sm:$0xff]  ;;  %v2359_v18 = vpack.i.bf16 %v301_v15, %v285_v14  ;;  %v254_v22 = vld [vmem:[%s3006_s28 + $0x70] sm:$0xff]  ;;  %v2361_v24 = vpack.i.bf16 %v302_v21, %v286_v20 }
  0x2b   : > { %v268_v11 = vld [vmem:[%s3006_s28 + $0xe0] sm:$0xff]  ;;  %v269_v17 = vld [vmem:[%s3006_s28 + $0xe8] sm:$0xff]  ;;  %v270_v23 = vld [vmem:[%s3006_s28 + $0xf0] sm:$0xff] }
  0x2c   : > { %2342 = vxpose.xlu1.b32.cont [5/16] (narrow) %v2341_v28, 64  ;;  %v2285_v13 = vpack.i.bf16 %v268_v11, %v252_v10  ;;  %v2287_v19 = vpack.i.bf16 %v269_v17, %v253_v16  ;;  %v2289_v25 = vpack.i.bf16 %v270_v23, %v254_v22  ;;  %v287_v26 = vld [vmem:[%s3006_s28 + $0x178] sm:$0xff]  ;;  %v2837_v30 = vld [vmem:[%s3456_s1 + $0x40] sm:$0xff]   ;;  %v2842_v43 = vld [vmem:[%s3456_s1 + $0x8] sm:$0xff]  }
  0x2d   : > { %v303_v27 = vld [vmem:[%s3006_s28 + $0x1f8] sm:$0xff]  ;;  %v1800_v32 = vld [vmem:[%s3006_s28 + $0x300] sm:$0xff]  ;;  %1998 = vmatprep.subr.bf16.mxu0 %v2837_v30  ;;  %v2843_v44 = vld [vmem:[%s3456_s1 + $0xc8] sm:$0xff]  }
  0x2e   : > { %2270 = vxpose.xlu0.b32.cont [5/16] (narrow) %v2269_v29, 64  ;;  %v255_v28 = vld [vmem:[%s3006_s28 + $0x78] sm:$0xff]  ;;  %v2363_v31 = vpack.i.bf16 %v303_v27, %v287_v26  ;;  %v1816_v33 = vld [vmem:[%s3006_s28 + $0x380] sm:$0xff]  ;;  %v2844_v45 = vld [vmem:[%s3456_s1 + $0x88] sm:$0xff]  }
  0x2f   : > { %v271_v29 = vld [vmem:[%s3006_s28 + $0xf8] sm:$0xff]  ;;  %v2838_v36 = vld [vmem:[%s3456_s1] sm:$0xff]   ;;  %v2477_v42 = vpack.i.bf16 %v1800_v32, %v1816_v33  ;;  %v2845_v48 = vld [vmem:[%s3456_s1 + $0x50] sm:$0xff]  }
  0x30   : > { %2344 = vxpose.xlu1.b32.cont [6/16] (narrow) %v2343_v34, 64  ;;  %v2291_v34 = vpack.i.bf16 %v271_v29, %v255_v28  ;;  %v2839_v37 = vld [vmem:[%s3456_s1 + $0xc0] sm:$0xff]   ;;  %1999 = vmatpush3.bf16.msra.mxu0 %v2838_v36  ;;  %v1769_v49 = vld [vmem:[%s3006_s28 + $0x208] sm:$0xff]  ;;  %v1802_v51 = vld [vmem:[%s3006_s28 + $0x310] sm:$0xff] }
  0x31   : > { %v1784_v38 = vld [vmem:[%s3006_s28 + $0x280] sm:$0xff]  ;;  %2110 = vmatprep.subr.bf16.mxu1 %v2839_v37  ;;  %v1785_v50 = vld [vmem:[%s3006_s28 + $0x288] sm:$0xff]  ;;  %v1770_v55 = vld [vmem:[%s3006_s28 + $0x210] sm:$0xff] }
  0x32   : > { %2272 = vxpose.xlu0.b32.cont [6/16] (narrow) %v2271_v35, 64  ;;  %v1768_v35 = vld [vmem:[%s3006_s28 + $0x200] sm:$0xff]  ;;  %v1786_v56 = vld [vmem:[%s3006_s28 + $0x290] sm:$0xff]  ;;  %v2849_v60 = vld [vmem:[%s3456_s1 + $0x58] sm:$0xff]  }
  0x33   : > { %v2840_v39 = vld [vmem:[%s3456_s1 + $0x80] sm:$0xff]   ;;  %v2847_v57 = vld [vmem:[%s3456_s1 + $0xd0] sm:$0xff]   ;;  %v1803_v61 = vld [vmem:[%s3006_s28 + $0x318] sm:$0xff]  ;;  %v2409_v2 = vpack.i.bf16 %v1786_v56, %v1770_v55 }
  0x34   : > { %2346 = vxpose.xlu1.b32.cont [7/16] (narrow) %v2345_v40, 64  ;;  %v2841_v40 = vld [vmem:[%s3456_s1 + $0x48] sm:$0xff]   ;;  %2111 = vmatpush3.bf16.msra.mxu1 %v2840_v39  ;;  %v1819_v62 = vld [vmem:[%s3006_s28 + $0x398] sm:$0xff]  ;;  %v1820_v8 = vld [vmem:[%s3006_s28 + $0x3a0] sm:$0xff] }
  0x35   : > { %2000 = vmatprep.subr.bf16.mxu0 %v2841_v40  ;;  %2112 = vmatprep.subr.bf16.mxu1 %v2843_v44  ;;  %v2850_v3 = vld [vmem:[%s3456_s1 + $0x18] sm:$0xff]   ;;  %v2853_v9 = vld [vmem:[%s3456_s1 + $0x60] sm:$0xff]   ;;  %v1805_v14 = vld [vmem:[%s3006_s28 + $0x328] sm:$0xff] }
  0x36   : > { %2274 = vxpose.xlu0.b32.cont [7/16] (narrow) %v2273_v41, 64  ;;  %v1801_v41 = vld [vmem:[%s3006_s28 + $0x308] sm:$0xff]  ;;  %2001 = vmatpush3.bf16.msra.mxu0 %v2842_v43  ;;  %v2851_v4 = vld [vmem:[%s3456_s1 + $0xd8] sm:$0xff]   ;;  %v1772_v11 = vld [vmem:[%s3006_s28 + $0x220] sm:$0xff] }
  0x37   : > { %2002 = vmatprep.subr.bf16.mxu0 %v2845_v48  ;;  %v2852_v5 = vld [vmem:[%s3456_s1 + $0x98] sm:$0xff]   ;;  %v2855_v15 = vld [vmem:[%s3456_s1 + $0xe0] sm:$0xff]   ;;  %v2857_v20 = vld [vmem:[%s3456_s1 + $0x68] sm:$0xff]  }
  0x38   : > { %2348 = vxpose.xlu1.b32.cont [8/16] (narrow) %v2347_v46, 64  ;;  %v2405_v46 = vpack.i.bf16 %v1784_v38, %v1768_v35  ;;  %2113 = vmatpush3.bf16.msra.mxu1 %v2844_v45  ;;  %v2856_v17 = vld [vmem:[%s3456_s1 + $0xa0] sm:$0xff]   ;;  %v1773_v21 = vld [vmem:[%s3006_s28 + $0x228] sm:$0xff]  ;;  %v1806_v23 = vld [vmem:[%s3006_s28 + $0x330] sm:$0xff] }
  0x39   : > { %2114 = vmatprep.subr.bf16.mxu1 %v2847_v57  ;;  %v1789_v22 = vld [vmem:[%s3006_s28 + $0x2a8] sm:$0xff]  ;;  %v1774_v27 = vld [vmem:[%s3006_s28 + $0x230] sm:$0xff]  ;;  %v1807_v33 = vld [vmem:[%s3006_s28 + $0x338] sm:$0xff] }
  0x3a   : > { %2276 = vxpose.xlu0.b32.cont [8/16] (narrow) %v2275_v47, 64  ;;  %v1817_v47 = vld [vmem:[%s3006_s28 + $0x388] sm:$0xff]  ;;  %v1790_v28 = vld [vmem:[%s3006_s28 + $0x2b0] sm:$0xff]  ;;  %v2415_v30 = vpack.i.bf16 %v1789_v22, %v1773_v21  ;;  %v1775_v36 = vld [vmem:[%s3006_s28 + $0x238] sm:$0xff] }
  0x3b   : > { %v2479_v54 = vpack.i.bf16 %v1801_v41, %v1817_v47  ;;  %v2859_v29 = vld [vmem:[%s3456_s1 + $0xe8] sm:$0xff]   ;;  %v2861_v32 = vld [vmem:[%s3456_s1 + $0x70] sm:$0xff]   ;;  %v1791_v37 = vld [vmem:[%s3006_s28 + $0x2b8] sm:$0xff]  ;;  %v2417_v38 = vpack.i.bf16 %v1790_v28, %v1774_v27 }
  0x3c   : > { %2350 = vxpose.xlu1.b32.cont [9/16] (narrow) %v2349_v52, 64  ;;  %v1818_v52 = vld [vmem:[%s3006_s28 + $0x390] sm:$0xff]  ;;  %v1808_v43 = vld [vmem:[%s3006_s28 + $0x340] sm:$0xff]  ;;  %v2865_v45 = vld [vmem:[%s3456_s1 + $0x78] sm:$0xff]  }
  0x3d   : > { %v2481_v63 = vpack.i.bf16 %v1802_v51, %v1818_v52  ;;  %v2862_v39 = vld [vmem:[%s3456_s1 + $0x30] sm:$0xff]   ;;  %v1824_v44 = vld [vmem:[%s3006_s28 + $0x3c0] sm:$0xff]  ;;  %v2868_v52 = vld [vmem:[%s3456_s1 + $0xb8] sm:$0xff]  }
  0x3e   : > { %2278 = vxpose.xlu0.b32.cont [9/16] (narrow) %v2277_v53, 64  ;;  %v2846_v53 = vld [vmem:[%s3456_s1 + $0x10] sm:$0xff]   ;;  %v1776_v47 = vld [vmem:[%s3006_s28 + $0x240] sm:$0xff]  ;;  %v2493_v51 = vpack.i.bf16 %v1808_v43, %v1824_v44  ;;  %v1825_v55 = vld [vmem:[%s3006_s28 + $0x3c8] sm:$0xff] }
  0x3f   : > { %2003 = vmatpush3.bf16.msra.mxu0 %v2846_v53  ;;  %v2863_v40 = vld [vmem:[%s3456_s1 + $0xf0] sm:$0xff]   ;;  %v1792_v48 = vld [vmem:[%s3006_s28 + $0x2c0] sm:$0xff]  ;;  %v1777_v56 = vld [vmem:[%s3006_s28 + $0x248] sm:$0xff] }
  0x40   : > { %2352 = vxpose.xlu1.b32.cont [10/16] (narrow) %v2351_v58, 64  ;;  %v2407_v58 = vpack.i.bf16 %v1785_v50, %v1769_v49  ;;  %2004 = vmatprep.subr.bf16.mxu0 %v2849_v60  ;;  %v2864_v41 = vld [vmem:[%s3456_s1 + $0xb0] sm:$0xff]   ;;  %v2866_v49 = vld [vmem:[%s3456_s1 + $0x38] sm:$0xff]   ;;  %v2421_v53 = vpack.i.bf16 %v1792_v48, %v1776_v47  ;;  %v1793_v57 = vld [vmem:[%s3006_s28 + $0x2c8] sm:$0xff] }
  0x41   : > { %v2867_v50 = vld [vmem:[%s3456_s1 + $0xf8] sm:$0xff]   ;;  %v1810_v60 = vld [vmem:[%s3006_s28 + $0x350] sm:$0xff] }
  0x42   : > { %2280 = vxpose.xlu0.b32.cont [10/16] (narrow) %v2279_v59, 64  ;;  %v2848_v59 = vld [vmem:[%s3456_s1 + $0x90] sm:$0xff]   ;;  %v1831_v27 = vld [vmem:[%s3006_s28 + $0x3f8] sm:$0xff] }
  0x43   : > { %2115 = vmatpush3.bf16.msra.mxu1 %v2848_v59  ;;  %2005 = vmatpush3.bf16.msra.mxu0 %v2850_v3  ;;  %v2423_v59 = vpack.i.bf16 %v1793_v57, %v1777_v56  ;;  %v1827_v3 = vld [vmem:[%s3006_s28 + $0x3d8] sm:$0xff]  ;;  %v1830_v21 = vld [vmem:[%s3006_s28 + $0x3f0] sm:$0xff] }
  0x44   : > { %2354 = vxpose.xlu1.b32.cont [11/16] (narrow) %v2353_v0, 64  ;;  %v1771_v0 = vld [vmem:[%s3006_s28 + $0x218] sm:$0xff]  ;;  %2116 = vmatprep.subr.bf16.mxu1 %v2851_v4  ;;  %v1782_v22 = vld [vmem:[%s3006_s28 + $0x270] sm:$0xff] }
  0x45   : > { %2006 = vmatprep.subr.bf16.mxu0 %v2853_v9  ;;  %v1779_v4 = vld [vmem:[%s3006_s28 + $0x258] sm:$0xff]  ;;  %v1828_v9 = vld [vmem:[%s3006_s28 + $0x3e0] sm:$0xff]  ;;  %v1866_v43 = vld [vmem:[%s3006_s28 + $0x510] sm:$0xff] }
  0x46   : > { %2282 = vxpose.xlu0.b32.cont [11/16] (narrow) %v2281_v1, 64  ;;  %v1787_v1 = vld [vmem:[%s3006_s28 + $0x298] sm:$0xff]  ;;  %v1834_v47 = vld [vmem:[%s3006_s28 + $0x410] sm:$0xff] }
  0x47   : > { %v2411_v10 = vpack.i.bf16 %v1787_v1, %v1771_v0  ;;  %2117 = vmatpush3.bf16.msra.mxu1 %v2852_v5  ;;  %v1795_v5 = vld [vmem:[%s3006_s28 + $0x2d8] sm:$0xff]  ;;  %v1850_v48 = vld [vmem:[%s3006_s28 + $0x490] sm:$0xff] }
  0x48   : > { %2356 = vxpose.xlu1.b32.cont [12/16] (narrow) %v2355_v6, 64  ;;  %v2483_v6 = vpack.i.bf16 %v1803_v61, %v1819_v62  ;;  %2118 = vmatprep.subr.bf16.mxu1 %v2855_v15  ;;  %v1826_v61 = vld [vmem:[%s3006_s28 + $0x3d0] sm:$0xff]  ;;  %v1829_v15 = vld [vmem:[%s3006_s28 + $0x3e8] sm:$0xff]  ;;  %v1783_v28 = vld [vmem:[%s3006_s28 + $0x278] sm:$0xff] }
  0x49   : > { %v1778_v62 = vld [vmem:[%s3006_s28 + $0x250] sm:$0xff]  ;;  %v2497_v0 = vpack.i.bf16 %v1810_v60, %v1826_v61  ;;  %v1867_v57 = vld [vmem:[%s3006_s28 + $0x518] sm:$0xff] }
  0x4a   : > { %2284 = vxpose.xlu0.b32.cont [12/16] (narrow) %v2283_v7, 64  ;;  %v1804_v7 = vld [vmem:[%s3006_s28 + $0x320] sm:$0xff] }
  0x4b   : > { %v2485_v16 = vpack.i.bf16 %v1804_v7, %v1820_v8  ;;  %2119 = vmatpush3.bf16.msra.mxu1 %v2856_v17  ;;  %v2427_v7 = vpack.i.bf16 %v1795_v5, %v1779_v4  ;;  %v1812_v8 = vld [vmem:[%s3006_s28 + $0x360] sm:$0xff]  ;;  %v1797_v17 = vld [vmem:[%s3006_s28 + $0x2e8] sm:$0xff] }
  0x4c   : > { %2358 = vxpose.xlu1.b32.cont [13/16] (narrow) %v2357_v12, 64  ;;  %v1788_v12 = vld [vmem:[%s3006_s28 + $0x2a0] sm:$0xff]  ;;  %2120 = vmatprep.subr.bf16.mxu1 %v2859_v29  ;;  %v1799_v29 = vld [vmem:[%s3006_s28 + $0x2f8] sm:$0xff] }
  0x4d   : > { %v1868_v5 = vld [vmem:[%s3006_s28 + $0x520] sm:$0xff] }
  0x4e   : > { %2286 = vxpose.xlu0.b32.cont [13/16] (narrow) %v2285_v13, 64  ;;  %v2854_v13 = vld [vmem:[%s3456_s1 + $0x20] sm:$0xff]  }
  0x4f   : > { %2007 = vmatpush3.bf16.msra.mxu0 %v2854_v13 }
  0x50   : > { %2360 = vxpose.xlu1.b32.cont [14/16] (narrow) %v2359_v18, 64  ;;  %v2413_v18 = vpack.i.bf16 %v1788_v12, %v1772_v11  ;;  %2008 = vmatprep.subr.bf16.mxu0 %v2857_v20  ;;  %v1796_v11 = vld [vmem:[%s3006_s28 + $0x2e0] sm:$0xff]  ;;  %v2501_v12 = vpack.i.bf16 %v1812_v8, %v1828_v9  ;;  %v1814_v20 = vld [vmem:[%s3006_s28 + $0x370] sm:$0xff] }
  0x52   : > { %2288 = vxpose.xlu0.b32.cont [14/16] (narrow) %v2287_v19, 64  ;;  %v1821_v19 = vld [vmem:[%s3006_s28 + $0x3a8] sm:$0xff] }
  0x53   : > { %v2487_v26 = vpack.i.bf16 %v1805_v14, %v1821_v19  ;;  %v1813_v14 = vld [vmem:[%s3006_s28 + $0x368] sm:$0xff] }
  0x54   : > { %2362 = vxpose.xlu1.b32.cont [15/16] (narrow) %v2361_v24, 64  ;;  %v1822_v24 = vld [vmem:[%s3006_s28 + $0x3b0] sm:$0xff] }
  0x55   : > { %v2489_v35 = vpack.i.bf16 %v1806_v23, %v1822_v24  ;;  %v1798_v23 = vld [vmem:[%s3006_s28 + $0x2f0] sm:$0xff]  ;;  %v2505_v24 = vpack.i.bf16 %v1814_v20, %v1830_v21  ;;  %v1869_v21 = vld [vmem:[%s3006_s28 + $0x528] sm:$0xff] }
  0x56   : > { %2290 = vxpose.xlu0.b32.cont [15/16] (narrow) %v2289_v25, 64  ;;  %v2858_v25 = vld [vmem:[%s3456_s1 + $0x28] sm:$0xff]  }
  0x57   : > { %2009 = vmatpush3.bf16.msra.mxu0 %v2858_v25  ;;  %v2433_v25 = vpack.i.bf16 %v1798_v23, %v1782_v22  ;;  %v1885_v22 = vld [vmem:[%s3006_s28 + $0x5a8] sm:$0xff] }
  0x58   : > { %2364 = vxpose.xlu1.b32.end [16/16] (narrow) %v2363_v31, 64  ;;  %v2860_v31 = vld [vmem:[%s3456_s1 + $0xa8] sm:$0xff]   ;;  %2010 = vmatprep.subr.bf16.mxu0 %v2861_v32  ;;  %v1864_v32 = vld [vmem:[%s3006_s28 + $0x500] sm:$0xff] }
  0x59   : > { %2121 = vmatpush3.bf16.msra.mxu1 %v2860_v31  ;;  %v2435_v31 = vpack.i.bf16 %v1799_v29, %v1783_v28 }
  0x5a   : > { %2292 = vxpose.xlu0.b32.end [16/16] (narrow) %v2291_v34, 64  ;;  %v1823_v34 = vld [vmem:[%s3006_s28 + $0x3b8] sm:$0xff]  ;;  %2122 = vmatprep.subr.bf16.mxu1 %v2863_v40  ;;  %v1833_v40 = vld [vmem:[%s3006_s28 + $0x408] sm:$0xff] }
  0x5b   : > { %2011 = vmatpush3.bf16.msra.mxu0 %v2862_v39  ;;  %v1881_v39 = vld [vmem:[%s3006_s28 + $0x588] sm:$0xff] }
  0x5c   : > { %2478 = vxpose.xlu1.b32.start [1/16] (narrow) %v2477_v42, 64  ;;  %v2491_v42 = vpack.i.bf16 %v1807_v33, %v1823_v34  ;;  %2012 = vmatprep.subr.bf16.mxu0 %v2865_v45  ;;  %v1880_v33 = vld [vmem:[%s3006_s28 + $0x580] sm:$0xff] }
  0x5d   : > { %2123 = vmatpush3.bf16.msra.mxu1 %v2864_v41  ;;  %v1832_v34 = vld [vmem:[%s3006_s28 + $0x400] sm:$0xff]  ;;  %v1849_v41 = vld [vmem:[%s3006_s28 + $0x488] sm:$0xff] }
  0x5e   : > { %2406 = vxpose.xlu0.b32.start [1/16] (narrow) %v2405_v46, 64  ;;  %v2419_v46 = vpack.i.bf16 %v1791_v37, %v1775_v36  ;;  %2124 = vmatprep.subr.bf16.mxu1 %v2867_v50  ;;  %v2621_v36 = vpack.i.bf16 %v1864_v32, %v1880_v33  ;;  %v2551_v45 = vpack.i.bf16 %v1833_v40, %v1849_v41  ;;  %v1870_v33 = vld [vmem:[%s3006_s28 + $0x530] sm:$0xff] }
  0x5f   : > { %2013 = vmatpush3.bf16.msra.mxu0 %v2866_v49  ;;  %v2631_v32 = vpack.i.bf16 %v1869_v21, %v1885_v22  ;;  %v1854_v40 = vld [vmem:[%s3006_s28 + $0x4b0] sm:$0xff] }
  0x60   : > { %2480 = vxpose.xlu1.b32.cont [2/16] (narrow) %v2479_v54, 64  ;;  %v1809_v54 = vld [vmem:[%s3006_s28 + $0x348] sm:$0xff] }
  0x61   : > { %2125 = vmatpush3.bf16.msra.mxu1 %v2868_v52 }
  0x62   : > { %2408 = vxpose.xlu0.b32.cont [2/16] (narrow) %v2407_v58, 64  ;;  %v2495_v58 = vpack.i.bf16 %v1809_v54, %v1825_v55 }
  0x64   : > { %2482 = vxpose.xlu1.b32.cont [3/16] (narrow) %v2481_v63, 64  ;;  %v1794_v63 = vld [vmem:[%s3006_s28 + $0x2d0] sm:$0xff] }
  0x65   : > { %v2425_v1 = vpack.i.bf16 %v1794_v63, %v1778_v62  ;;  %v1835_v62 = vld [vmem:[%s3006_s28 + $0x418] sm:$0xff] }
  0x66   : > { %2410 = vxpose.xlu0.b32.cont [3/16] (narrow) %v2409_v2, 64  ;;  %v1811_v2 = vld [vmem:[%s3006_s28 + $0x358] sm:$0xff] }
  0x67   : > { %v1851_v63 = vld [vmem:[%s3006_s28 + $0x498] sm:$0xff] }
  0x68   : > { %2484 = vxpose.xlu1.b32.cont [4/16] (narrow) %v2483_v6, 64  ;;  %v2499_v6 = vpack.i.bf16 %v1811_v2, %v1827_v3  ;;  %v2555_v9 = vpack.i.bf16 %v1835_v62, %v1851_v63 }
  0x6a   : > { %2412 = vxpose.xlu0.b32.cont [4/16] (narrow) %v2411_v10, 64  ;;  %v1780_v10 = vld [vmem:[%s3006_s28 + $0x260] sm:$0xff] }
  0x6b   : > { %v2429_v13 = vpack.i.bf16 %v1796_v11, %v1780_v10  ;;  %v1884_v10 = vld [vmem:[%s3006_s28 + $0x5a0] sm:$0xff] }
  0x6c   : > { %2486 = vxpose.xlu1.b32.cont [5/16] (narrow) %v2485_v16, 64  ;;  %v1781_v16 = vld [vmem:[%s3006_s28 + $0x268] sm:$0xff]  ;;  %v1836_v11 = vld [vmem:[%s3006_s28 + $0x420] sm:$0xff] }
  0x6d   : > { %v2431_v19 = vpack.i.bf16 %v1797_v17, %v1781_v16  ;;  %v2629_v16 = vpack.i.bf16 %v1868_v5, %v1884_v10 }
  0x6e   : > { %2414 = vxpose.xlu0.b32.cont [5/16] (narrow) %v2413_v18, 64  ;;  %v2503_v18 = vpack.i.bf16 %v1813_v14, %v1829_v15 }
  0x70   : > { %2488 = vxpose.xlu1.b32.cont [6/16] (narrow) %v2487_v26, 64  ;;  %v1815_v26 = vld [vmem:[%s3006_s28 + $0x378] sm:$0xff] }
  0x72   : > { %2416 = vxpose.xlu0.b32.cont [6/16] (narrow) %v2415_v30, 64  ;;  %v2507_v30 = vpack.i.bf16 %v1815_v26, %v1831_v27  ;;  %v1837_v26 = vld [vmem:[%s3006_s28 + $0x428] sm:$0xff] }
  0x73   : > { %v1853_v27 = vld [vmem:[%s3006_s28 + $0x4a8] sm:$0xff] }
  0x74   : > { %2490 = vxpose.xlu1.b32.cont [7/16] (narrow) %v2489_v35, 64  ;;  %v1848_v35 = vld [vmem:[%s3006_s28 + $0x480] sm:$0xff] }
  0x75   : > { %v2549_v37 = vpack.i.bf16 %v1832_v34, %v1848_v35 }
  0x76   : > { %2418 = vxpose.xlu0.b32.cont [7/16] (narrow) %v2417_v38, 64  ;;  %v1865_v38 = vld [vmem:[%s3006_s28 + $0x508] sm:$0xff] }
  0x78   : > { %2492 = vxpose.xlu1.b32.cont [8/16] (narrow) %v2491_v42, 64  ;;  %v2623_v42 = vpack.i.bf16 %v1865_v38, %v1881_v39  ;;  %v1886_v38 = vld [vmem:[%s3006_s28 + $0x5b0] sm:$0xff] }
  0x79   : > { %v1838_v39 = vld [vmem:[%s3006_s28 + $0x430] sm:$0xff] }
  0x7a   : > { %2420 = vxpose.xlu0.b32.cont [8/16] (narrow) %v2419_v46, 64  ;;  %v1882_v46 = vld [vmem:[%s3006_s28 + $0x590] sm:$0xff] }
  0x7b   : > { %v2625_v52 = vpack.i.bf16 %v1866_v43, %v1882_v46 }
  0x7c   : > { %2494 = vxpose.xlu1.b32.cont [9/16] (narrow) %v2493_v51, 64 }
  0x7e   : > { %2422 = vxpose.xlu0.b32.cont [9/16] (narrow) %v2421_v53, 64  ;;  %v2553_v53 = vpack.i.bf16 %v1834_v47, %v1850_v48 }
  0x80   : > { %2496 = vxpose.xlu1.b32.cont [10/16] (narrow) %v2495_v58, 64  ;;  %v1883_v58 = vld [vmem:[%s3006_s28 + $0x598] sm:$0xff] }
  0x81   : > { %v2627_v4 = vpack.i.bf16 %v1867_v57, %v1883_v58 }
  0x82   : > { %2424 = vxpose.xlu0.b32.cont [10/16] (narrow) %v2423_v59, 64 }
  0x84   : > { %2498 = vxpose.xlu1.b32.cont [11/16] (narrow) %v2497_v0, 64 }
  0x86   : > { %2426 = vxpose.xlu0.b32.cont [11/16] (narrow) %v2425_v1, 64 }
  0x88   : > { %2500 = vxpose.xlu1.b32.cont [12/16] (narrow) %v2499_v6, 64 }
  0x8a   : > { %2428 = vxpose.xlu0.b32.cont [12/16] (narrow) %v2427_v7, 64 }
  0x8c   : > { %2502 = vxpose.xlu1.b32.cont [13/16] (narrow) %v2501_v12, 64  ;;  %v1852_v12 = vld [vmem:[%s3006_s28 + $0x4a0] sm:$0xff] }
  0x8d   : > { %v2557_v17 = vpack.i.bf16 %v1836_v11, %v1852_v12 }
  0x8e   : > { %2430 = vxpose.xlu0.b32.cont [13/16] (narrow) %v2429_v13, 64 }
  0x90   : > { %2504 = vxpose.xlu1.b32.cont [14/16] (narrow) %v2503_v18, 64 }
  0x92   : > { %2432 = vxpose.xlu0.b32.cont [14/16] (narrow) %v2431_v19, 64 }
  0x94   : > { %2506 = vxpose.xlu1.b32.cont [15/16] (narrow) %v2505_v24, 64 }
  0x96   : > { %2434 = vxpose.xlu0.b32.cont [15/16] (narrow) %v2433_v25, 64 }
  0x98   : > { %2508 = vxpose.xlu1.b32.end [16/16] (narrow) %v2507_v30, 64 }
  0x9a   : > { %2436 = vxpose.xlu0.b32.end [16/16] (narrow) %v2435_v31, 64 }
  0x9c   : > { %2622 = vxpose.xlu1.b32.start [1/16] (narrow) %v2621_v36, 64  ;;  %v2365_v44 = vpop.trf.xlu1 }
  0x9d   : > { %v2366_v50 = vunpack.i.l.bf16 %v2365_v44  ;;  %v2369_v51 = vunpack.i.h.bf16 %v2365_v44  ;;  %v2633_v44 = vpack.i.bf16 %v1870_v33, %v1886_v38 }
  0x9e   : > { %2550 = vxpose.xlu0.b32.start [1/16] (narrow) %v2549_v37, 64  ;;  %v2293_v49 = vpop.trf.xlu0  ;;  %v2559_v37 = vpack.i.bf16 %v1837_v26, %v1853_v27 }
  0x9f   : > { %v2294_v54 = vunpack.i.l.bf16 %v2293_v49  ;;  %v2297_v56 = vunpack.i.h.bf16 %v2293_v49  ;;  %v1871_v49 = vld [vmem:[%s3006_s28 + $0x538] sm:$0xff] }
  0xa0   : > { %2624 = vxpose.xlu1.b32.cont [2/16] (narrow) %v2623_v42, 64  ;;  %v2370_v55 = vpop.trf.xlu1 }
  0xa1   : > { %v2371_v60 = vunpack.i.l.bf16 %v2370_v55  ;;  %v2374_v61 = vunpack.i.h.bf16 %v2370_v55  ;;  %v1855_v55 = vld [vmem:[%s3006_s28 + $0x4b8] sm:$0xff] }
  0xa2   : > { %2552 = vxpose.xlu0.b32.cont [2/16] (narrow) %v2551_v45, 64  ;;  %v2298_v59 = vpop.trf.xlu0  ;;  %v2561_v45 = vpack.i.bf16 %v1838_v39, %v1854_v40  ;;  %v1876_v40 = vld [vmem:[%s3006_s28 + $0x560] sm:$0xff] }
  0xa3   : > { %v2299_v0 = vunpack.i.l.bf16 %v2298_v59  ;;  %v2302_v1 = vunpack.i.h.bf16 %v2298_v59  ;;  %v1014_v2 = vpack.c.bf16 %v2374_v61, %v2369_v51  ;;  %v1013_v3 = vpack.c.bf16 %v2371_v60, %v2366_v50  ;;  %v1887_v50 = vld [vmem:[%s3006_s28 + $0x5b8] sm:$0xff]  ;;  %v1872_v61 = vld [vmem:[%s3006_s28 + $0x540] sm:$0xff] }
  0xa4   : > { %2626 = vxpose.xlu1.b32.cont [3/16] (narrow) %v2625_v52, 64  ;;  %v2375_v7 = vpop.trf.xlu1  ;;  %v2635_v60 = vpack.i.bf16 %v1871_v49, %v1887_v50  ;;  %v1861_v49 = vld [vmem:[%s3006_s28 + $0x4e8] sm:$0xff] }
  0xa5   : > { %v1012_v6 = vpack.c.bf16 %v2302_v1, %v2297_v56  ;;  %v1011_v8 = vpack.c.bf16 %v2299_v0, %v2294_v54  ;;  %1466 = vmatprep.mubr.bf16.mxu1 %v1014_v2  ;;  %v2379_v14 = vunpack.i.h.bf16 %v2375_v7  ;;  %v2376_v15 = vunpack.i.l.bf16 %v2375_v7  ;;  %v1839_v54 = vld [vmem:[%s3006_s28 + $0x438] sm:$0xff]  ;;  %v1888_v2 = vld [vmem:[%s3006_s28 + $0x5c0] sm:$0xff] }
  0xa6   : > { %2554 = vxpose.xlu0.b32.cont [3/16] (narrow) %v2553_v53, 64  ;;  %v2303_v13 = vpop.trf.xlu0  ;;  %1467 = vmatmul.mubr.bf16.vlgmr.msra.gmra.mrb[0].mxu1 %v1013_v3  ;;  %v2563_v1 = vpack.i.bf16 %v1839_v54, %v1855_v55  ;;  %v1840_v3 = vld [vmem:[%s3006_s28 + $0x440] sm:$0xff]  ;;  %v1846_v54 = vld [vmem:[%s3006_s28 + $0x470] sm:$0xff] }
  0xa7   : > { %1305 = vmatprep.mubr.bf16.mxu0 %v1012_v6  ;;  %v2307_v18 = vunpack.i.h.bf16 %v2303_v13  ;;  %v2304_v19 = vunpack.i.l.bf16 %v2303_v13  ;;  %v1873_v13 = vld [vmem:[%s3006_s28 + $0x548] sm:$0xff]  ;;  %v1862_v55 = vld [vmem:[%s3006_s28 + $0x4f0] sm:$0xff] }
  0xa8   : > { %1306 = vmatmul.mubr.bf16.vlgmr.msra.gmra.mrb[0].mxu0 %v1011_v8  ;;  %2628 = vxpose.xlu1.b32.cont [4/16] (narrow) %v2627_v4, 64  ;;  %v2380_v20 = vpop.trf.xlu1  ;;  %v1856_v4 = vld [vmem:[%s3006_s28 + $0x4c0] sm:$0xff]  ;;  %v2637_v8 = vpack.i.bf16 %v1872_v61, %v1888_v2  ;;  %v1863_v61 = vld [vmem:[%s3006_s28 + $0x4f8] sm:$0xff] }
  0xa9   : > { %v2384_v24 = vunpack.i.h.bf16 %v2380_v20  ;;  %v2381_v25 = vunpack.i.l.bf16 %v2380_v20  ;;  %v1896_v2 = vld [vmem:[%s3006_s28 + $0x600] sm:$0xff] }
  0xaa   : > { %2556 = vxpose.xlu0.b32.cont [4/16] (narrow) %v2555_v9, 64  ;;  %v2308_v23 = vpop.trf.xlu0  ;;  %v2565_v9 = vpack.i.bf16 %v1840_v3, %v1856_v4  ;;  %v1912_v3 = vld [vmem:[%s3006_s28 + $0x680] sm:$0xff] }
  0xab   : > { %v2312_v28 = vunpack.i.h.bf16 %v2308_v23  ;;  %v2309_v29 = vunpack.i.l.bf16 %v2308_v23  ;;  %v1018_v30 = vpack.c.bf16 %v2384_v24, %v2379_v14  ;;  %v1017_v31 = vpack.c.bf16 %v2381_v25, %v2376_v15  ;;  %v1889_v14 = vld [vmem:[%s3006_s28 + $0x5c8] sm:$0xff] }
  0xac   : > { %2630 = vxpose.xlu1.b32.cont [5/16] (narrow) %v2629_v16, 64  ;;  %v2385_v35 = vpop.trf.xlu1  ;;  %v2639_v24 = vpack.i.bf16 %v1873_v13, %v1889_v14  ;;  %v1946_v14 = vld [vmem:[%s3006_s28 + $0x790] sm:$0xff] }
  0xad   : > { %v1016_v34 = vpack.c.bf16 %v2312_v28, %v2307_v18  ;;  %v1015_v36 = vpack.c.bf16 %v2309_v29, %v2304_v19  ;;  %1474 = vmatprep.mubr.bf16.mxu1 %v1018_v30  ;;  %v2389_v42 = vunpack.i.h.bf16 %v2385_v35  ;;  %v2386_v43 = vunpack.i.l.bf16 %v2385_v35  ;;  %v1841_v18 = vld [vmem:[%s3006_s28 + $0x448] sm:$0xff]  ;;  %v1874_v28 = vld [vmem:[%s3006_s28 + $0x550] sm:$0xff]  ;;  %v1891_v35 = vld [vmem:[%s3006_s28 + $0x5d8] sm:$0xff] }
  0xae   : > { %2558 = vxpose.xlu0.b32.cont [5/16] (narrow) %v2557_v17, 64  ;;  %v2313_v41 = vpop.trf.xlu0  ;;  %1475 = vmatmul.mubr.bf16.gmra.mrb[4].mxu1 %v1017_v31  ;;  %v1857_v19 = vld [vmem:[%s3006_s28 + $0x4c8] sm:$0xff]  ;;  %v1890_v29 = vld [vmem:[%s3006_s28 + $0x5d0] sm:$0xff] }
  0xaf   : > { %1313 = vmatprep.mubr.bf16.mxu0 %v1016_v34  ;;  %v2317_v46 = vunpack.i.h.bf16 %v2313_v41  ;;  %v2314_v47 = vunpack.i.l.bf16 %v2313_v41  ;;  %v2567_v27 = vpack.i.bf16 %v1841_v18, %v1857_v19  ;;  %v1842_v30 = vld [vmem:[%s3006_s28 + $0x450] sm:$0xff]  ;;  %v1875_v34 = vld [vmem:[%s3006_s28 + $0x558] sm:$0xff]  ;;  %v1892_v41 = vld [vmem:[%s3006_s28 + $0x5e0] sm:$0xff] }
  0xb0   : > { %1314 = vmatmul.mubr.bf16.gmra.mrb[4].mxu0 %v1015_v36  ;;  %2632 = vxpose.xlu1.b32.cont [6/16] (narrow) %v2631_v32, 64  ;;  %v2390_v48 = vpop.trf.xlu1  ;;  %v1858_v31 = vld [vmem:[%s3006_s28 + $0x4d0] sm:$0xff]  ;;  %v2641_v32 = vpack.i.bf16 %v1874_v28, %v1890_v29  ;;  %v1843_v36 = vld [vmem:[%s3006_s28 + $0x458] sm:$0xff]  ;;  %v2643_v38 = vpack.i.bf16 %v1875_v34, %v1891_v35 }
  0xb1   : > { %v2394_v52 = vunpack.i.h.bf16 %v2390_v48  ;;  %v2391_v53 = vunpack.i.l.bf16 %v2390_v48  ;;  %v2569_v33 = vpack.i.bf16 %v1842_v30, %v1858_v31  ;;  %v1845_v48 = vld [vmem:[%s3006_s28 + $0x468] sm:$0xff]  ;;  %v1899_v30 = vld [vmem:[%s3006_s28 + $0x618] sm:$0xff] }
  0xb2   : > { %2560 = vxpose.xlu0.b32.cont [6/16] (narrow) %v2559_v37, 64  ;;  %v2318_v51 = vpop.trf.xlu0  ;;  %v1859_v37 = vld [vmem:[%s3006_s28 + $0x4d8] sm:$0xff] }
  0xb3   : > { %v2322_v56 = vunpack.i.h.bf16 %v2318_v51  ;;  %v2319_v57 = vunpack.i.l.bf16 %v2318_v51  ;;  %v1022_v58 = vpack.c.bf16 %v2394_v52, %v2389_v42  ;;  %v1021_v59 = vpack.c.bf16 %v2391_v53, %v2386_v43  ;;  %v1844_v42 = vld [vmem:[%s3006_s28 + $0x460] sm:$0xff]  ;;  %v1878_v52 = vld [vmem:[%s3006_s28 + $0x570] sm:$0xff]  ;;  %v1915_v31 = vld [vmem:[%s3006_s28 + $0x698] sm:$0xff] }
  0xb4   : > { %2634 = vxpose.xlu1.b32.cont [7/16] (narrow) %v2633_v44, 64  ;;  %v2395_v63 = vpop.trf.xlu1  ;;  %v2571_v39 = vpack.i.bf16 %v1843_v36, %v1859_v37  ;;  %v1860_v43 = vld [vmem:[%s3006_s28 + $0x4e0] sm:$0xff]  ;;  %v2645_v44 = vpack.i.bf16 %v1876_v40, %v1892_v41  ;;  %v2575_v51 = vpack.i.bf16 %v1845_v48, %v1861_v49  ;;  %v1894_v53 = vld [vmem:[%s3006_s28 + $0x5f0] sm:$0xff]  ;;  %v2699_v41 = vpack.i.bf16 %v1899_v30, %v1915_v31 }
  0xb5   : > { %v1020_v62 = vpack.c.bf16 %v2322_v56, %v2317_v46  ;;  %v1019_v0 = vpack.c.bf16 %v2319_v57, %v2314_v47  ;;  %1482 = vmatprep.mubr.bf16.mxu1 %v1022_v58  ;;  %v2399_v6 = vunpack.i.h.bf16 %v2395_v63  ;;  %v2396_v7 = vunpack.i.l.bf16 %v2395_v63  ;;  %v1877_v46 = vld [vmem:[%s3006_s28 + $0x568] sm:$0xff]  ;;  %v1879_v58 = vld [vmem:[%s3006_s28 + $0x578] sm:$0xff]  ;;  %v1932_v37 = vld [vmem:[%s3006_s28 + $0x720] sm:$0xff] }
  0xb6   : > { %2562 = vxpose.xlu0.b32.cont [7/16] (narrow) %v2561_v45, 64  ;;  %v2323_v5 = vpop.trf.xlu0  ;;  %1483 = vmatmul.mubr.bf16.gmra.mrb[8].mxu1 %v1021_v59  ;;  %v2573_v45 = vpack.i.bf16 %v1844_v42, %v1860_v43  ;;  %v1893_v47 = vld [vmem:[%s3006_s28 + $0x5e8] sm:$0xff]  ;;  %v2649_v56 = vpack.i.bf16 %v1878_v52, %v1894_v53  ;;  %v2577_v57 = vpack.i.bf16 %v1846_v54, %v1862_v55  ;;  %v1895_v59 = vld [vmem:[%s3006_s28 + $0x5f8] sm:$0xff]  ;;  %v1948_v42 = vld [vmem:[%s3006_s28 + $0x7a0] sm:$0xff] }
  0xb7   : > { %1321 = vmatprep.mubr.bf16.mxu0 %v1020_v62  ;;  %v2327_v10 = vunpack.i.h.bf16 %v2323_v5  ;;  %v2324_v11 = vunpack.i.l.bf16 %v2323_v5  ;;  %v2647_v50 = vpack.i.bf16 %v1877_v46, %v1893_v47  ;;  %v2651_v62 = vpack.i.bf16 %v1879_v58, %v1895_v59  ;;  %v1900_v43 = vld [vmem:[%s3006_s28 + $0x620] sm:$0xff]  ;;  %v1933_v53 = vld [vmem:[%s3006_s28 + $0x728] sm:$0xff] }
  0xb8   : > { %1322 = vmatmul.mubr.bf16.gmra.mrb[8].mxu0 %v1019_v0  ;;  %2636 = vxpose.xlu1.b32.cont [8/16] (narrow) %v2635_v60, 64  ;;  %v2400_v12 = vpop.trf.xlu1  ;;  %v1847_v60 = vld [vmem:[%s3006_s28 + $0x478] sm:$0xff]  ;;  %v1928_v0 = vld [vmem:[%s3006_s28 + $0x700] sm:$0xff]  ;;  %v2693_v5 = vpack.i.bf16 %v1896_v2, %v1912_v3  ;;  %v2773_v48 = vpack.i.bf16 %v1932_v37, %v1948_v42  ;;  %v1949_v54 = vld [vmem:[%s3006_s28 + $0x7a8] sm:$0xff] }
  0xb9   : > { %v2404_v16 = vunpack.i.h.bf16 %v2400_v12  ;;  %v2401_v17 = vunpack.i.l.bf16 %v2400_v12  ;;  %v2579_v63 = vpack.i.bf16 %v1847_v60, %v1863_v61  ;;  %v1901_v58 = vld [vmem:[%s3006_s28 + $0x628] sm:$0xff] }
  0xba   : > { %2564 = vxpose.xlu0.b32.cont [8/16] (narrow) %v2563_v1, 64  ;;  %v2328_v15 = vpop.trf.xlu0  ;;  %v1944_v1 = vld [vmem:[%s3006_s28 + $0x780] sm:$0xff]  ;;  %v1917_v59 = vld [vmem:[%s3006_s28 + $0x6a8] sm:$0xff] }
  0xbb   : > { %v2332_v20 = vunpack.i.h.bf16 %v2328_v15  ;;  %v2329_v21 = vunpack.i.l.bf16 %v2328_v15  ;;  %v1026_v22 = vpack.c.bf16 %v2404_v16, %v2399_v6  ;;  %v1025_v23 = vpack.c.bf16 %v2401_v17, %v2396_v7  ;;  %v1929_v6 = vld [vmem:[%s3006_s28 + $0x708] sm:$0xff]  ;;  %v1898_v15 = vld [vmem:[%s3006_s28 + $0x610] sm:$0xff] }
  0xbc   : > { %2638 = vxpose.xlu1.b32.cont [9/16] (narrow) %v2637_v8, 64  ;;  %v2765_v4 = vpack.i.bf16 %v1928_v0, %v1944_v1  ;;  %v1945_v7 = vld [vmem:[%s3006_s28 + $0x788] sm:$0xff]  ;;  %v1914_v16 = vld [vmem:[%s3006_s28 + $0x690] sm:$0xff]  ;;  %v2775_v0 = vpack.i.bf16 %v1933_v53, %v1949_v54 }
  0xbd   : > { %v1024_v25 = vpack.c.bf16 %v2332_v20, %v2327_v10  ;;  %v1023_v26 = vpack.c.bf16 %v2329_v21, %v2324_v11  ;;  %1490 = vmatprep.mubr.bf16.mxu1 %v1026_v22  ;;  %v1897_v8 = vld [vmem:[%s3006_s28 + $0x608] sm:$0xff]  ;;  %v2767_v10 = vpack.i.bf16 %v1929_v6, %v1945_v7  ;;  %v1930_v11 = vld [vmem:[%s3006_s28 + $0x710] sm:$0xff]  ;;  %v2697_v21 = vpack.i.bf16 %v1898_v15, %v1914_v16 }
  0xbe   : > { %2566 = vxpose.xlu0.b32.cont [9/16] (narrow) %v2565_v9, 64  ;;  %1491 = vmatmul.mubr.bf16.gmra.mrb[12].mxu1 %v1025_v23  ;;  %v1913_v9 = vld [vmem:[%s3006_s28 + $0x688] sm:$0xff]  ;;  %v2769_v20 = vpack.i.bf16 %v1930_v11, %v1946_v14  ;;  %v1934_v1 = vld [vmem:[%s3006_s28 + $0x730] sm:$0xff] }
  0xbf   : > { %1329 = vmatprep.mubr.bf16.mxu0 %v1024_v25  ;;  %v2695_v13 = vpack.i.bf16 %v1897_v8, %v1913_v9  ;;  %v1931_v25 = vld [vmem:[%s3006_s28 + $0x718] sm:$0xff]  ;;  %v1950_v6 = vld [vmem:[%s3006_s28 + $0x7b0] sm:$0xff] }
  0xc0   : > { %1330 = vmatmul.mubr.bf16.gmra.mrb[12].mxu0 %v1023_v26  ;;  %2640 = vxpose.xlu1.b32.cont [10/16] (narrow) %v2639_v24, 64  ;;  %v1947_v26 = vld [vmem:[%s3006_s28 + $0x798] sm:$0xff]  ;;  %v1902_v7 = vld [vmem:[%s3006_s28 + $0x630] sm:$0xff] }
  0xc1   : > { %v2771_v36 = vpack.i.bf16 %v1931_v25, %v1947_v26  ;;  %v1918_v8 = vld [vmem:[%s3006_s28 + $0x6b0] sm:$0xff] }
  0xc2   : > { %2568 = vxpose.xlu0.b32.cont [10/16] (narrow) %v2567_v27, 64 }
  0xc4   : > { %2642 = vxpose.xlu1.b32.cont [11/16] (narrow) %v2641_v32, 64 }
  0xc6   : > { %2570 = vxpose.xlu0.b32.cont [11/16] (narrow) %v2569_v33, 64 }
  0xc8   : > { %2644 = vxpose.xlu1.b32.cont [12/16] (narrow) %v2643_v38, 64 }
  0xca   : > { %2572 = vxpose.xlu0.b32.cont [12/16] (narrow) %v2571_v39, 64 }
  0xcc   : > { %2646 = vxpose.xlu1.b32.cont [13/16] (narrow) %v2645_v44, 64  ;;  %v1916_v44 = vld [vmem:[%s3006_s28 + $0x6a0] sm:$0xff] }
  0xcd   : > { %v2701_v49 = vpack.i.bf16 %v1900_v43, %v1916_v44 }
  0xce   : > { %2574 = vxpose.xlu0.b32.cont [13/16] (narrow) %v2573_v45, 64 }
  0xd0   : > { %2648 = vxpose.xlu1.b32.cont [14/16] (narrow) %v2647_v50, 64 }
  0xd2   : > { %2576 = vxpose.xlu0.b32.cont [14/16] (narrow) %v2575_v51, 64 }
  0xd4   : > { %2650 = vxpose.xlu1.b32.cont [15/16] (narrow) %v2649_v56, 64 }
  0xd6   : > { %2578 = vxpose.xlu0.b32.cont [15/16] (narrow) %v2577_v57, 64 }
  0xd8   : > { %2652 = vxpose.xlu1.b32.end [16/16] (narrow) %v2651_v62, 64 }
  0xda   : > { %2580 = vxpose.xlu0.b32.end [16/16] (narrow) %v2579_v63, 64 }
  0xdc   : > { %2766 = vxpose.xlu1.b32.start [1/16] (narrow) %v2765_v4, 64  ;;  %v2509_v12 = vpop.trf.xlu1 }
  0xdd   : > { %v2513_v18 = vunpack.i.h.bf16 %v2509_v12  ;;  %v2510_v19 = vunpack.i.l.bf16 %v2509_v12  ;;  %v2777_v12 = vpack.i.bf16 %v1934_v1, %v1950_v6 }
  0xde   : > { %2694 = vxpose.xlu0.b32.start [1/16] (narrow) %v2693_v5, 64  ;;  %v2437_v17 = vpop.trf.xlu0  ;;  %v2703_v5 = vpack.i.bf16 %v1901_v58, %v1917_v59 }
  0xdf   : > { %v2441_v22 = vunpack.i.h.bf16 %v2437_v17  ;;  %v2438_v23 = vunpack.i.l.bf16 %v2437_v17  ;;  %v1935_v17 = vld [vmem:[%s3006_s28 + $0x738] sm:$0xff] }
  0xe0   : > { %2768 = vxpose.xlu1.b32.cont [2/16] (narrow) %v2767_v10, 64  ;;  %v2514_v24 = vpop.trf.xlu1 }
  0xe1   : > { %v2518_v28 = vunpack.i.h.bf16 %v2514_v24  ;;  %v2515_v29 = vunpack.i.l.bf16 %v2514_v24 }
  0xe2   : > { %2696 = vxpose.xlu0.b32.cont [2/16] (narrow) %v2695_v13, 64  ;;  %v2442_v27 = vpop.trf.xlu0  ;;  %v2705_v13 = vpack.i.bf16 %v1902_v7, %v1918_v8  ;;  %v1940_v8 = vld [vmem:[%s3006_s28 + $0x760] sm:$0xff] }
  0xe3   : > { %v2446_v32 = vunpack.i.h.bf16 %v2442_v27  ;;  %v2443_v33 = vunpack.i.l.bf16 %v2442_v27  ;;  %v1030_v34 = vpack.c.bf16 %v2515_v29, %v2510_v19  ;;  %v1029_v35 = vpack.c.bf16 %v2518_v28, %v2513_v18  ;;  %v1951_v18 = vld [vmem:[%s3006_s28 + $0x7b8] sm:$0xff]  ;;  %v1936_v29 = vld [vmem:[%s3006_s28 + $0x740] sm:$0xff] }
  0xe4   : > { %2770 = vxpose.xlu1.b32.cont [3/16] (narrow) %v2769_v20, 64  ;;  %v2519_v39 = vpop.trf.xlu1  ;;  %v2779_v28 = vpack.i.bf16 %v1935_v17, %v1951_v18  ;;  %v1925_v17 = vld [vmem:[%s3006_s28 + $0x6e8] sm:$0xff] }
  0xe5   : > { %v1028_v38 = vpack.c.bf16 %v2446_v32, %v2441_v22  ;;  %v1027_v40 = vpack.c.bf16 %v2443_v33, %v2438_v23  ;;  %1498 = vmatprep.mubr.bf16.mxu1 %v1030_v34  ;;  %v2523_v46 = vunpack.i.h.bf16 %v2519_v39  ;;  %v2520_v47 = vunpack.i.l.bf16 %v2519_v39  ;;  %v1903_v22 = vld [vmem:[%s3006_s28 + $0x638] sm:$0xff]  ;;  %v1952_v34 = vld [vmem:[%s3006_s28 + $0x7c0] sm:$0xff] }
  0xe6   : > { %2698 = vxpose.xlu0.b32.cont [3/16] (narrow) %v2697_v21, 64  ;;  %v2447_v45 = vpop.trf.xlu0  ;;  %1499 = vmatmul.mubr.bf16.gmra.mrb[16].mxu1 %v1029_v35  ;;  %v1919_v23 = vld [vmem:[%s3006_s28 + $0x6b8] sm:$0xff]  ;;  %v1904_v35 = vld [vmem:[%s3006_s28 + $0x640] sm:$0xff] }
  0xe7   : > { %1337 = vmatprep.mubr.bf16.mxu0 %v1028_v38  ;;  %v2451_v50 = vunpack.i.h.bf16 %v2447_v45  ;;  %v2448_v51 = vunpack.i.l.bf16 %v2447_v45  ;;  %v2707_v33 = vpack.i.bf16 %v1903_v22, %v1919_v23  ;;  %v1937_v45 = vld [vmem:[%s3006_s28 + $0x748] sm:$0xff]  ;;  %v1910_v22 = vld [vmem:[%s3006_s28 + $0x670] sm:$0xff] }
  0xe8   : > { %1338 = vmatmul.mubr.bf16.gmra.mrb[16].mxu0 %v1027_v40  ;;  %2772 = vxpose.xlu1.b32.cont [4/16] (narrow) %v2771_v36, 64  ;;  %v2524_v52 = vpop.trf.xlu1  ;;  %v1920_v36 = vld [vmem:[%s3006_s28 + $0x6c0] sm:$0xff]  ;;  %v2781_v40 = vpack.i.bf16 %v1936_v29, %v1952_v34  ;;  %v1926_v23 = vld [vmem:[%s3006_s28 + $0x6f0] sm:$0xff]  ;;  %v1927_v29 = vld [vmem:[%s3006_s28 + $0x6f8] sm:$0xff] }
  0xe9   : > { %v2528_v56 = vunpack.i.h.bf16 %v2524_v52  ;;  %v2525_v57 = vunpack.i.l.bf16 %v2524_v52 }
  0xea   : > { %2700 = vxpose.xlu0.b32.cont [4/16] (narrow) %v2699_v41, 64  ;;  %v2452_v55 = vpop.trf.xlu0  ;;  %v2709_v41 = vpack.i.bf16 %v1904_v35, %v1920_v36 }
  0xeb   : > { %v2456_v60 = vunpack.i.h.bf16 %v2452_v55  ;;  %v2453_v61 = vunpack.i.l.bf16 %v2452_v55  ;;  %v1034_v62 = vpack.c.bf16 %v2525_v57, %v2520_v47  ;;  %v1033_v63 = vpack.c.bf16 %v2528_v56, %v2523_v46  ;;  %v1953_v46 = vld [vmem:[%s3006_s28 + $0x7c8] sm:$0xff] }
  0xec   : > { %2774 = vxpose.xlu1.b32.cont [5/16] (narrow) %v2773_v48, 64  ;;  %v2529_v3 = vpop.trf.xlu1  ;;  %v2783_v56 = vpack.i.bf16 %v1937_v45, %v1953_v46 }
  0xed   : > { %v1032_v2 = vpack.c.bf16 %v2456_v60, %v2451_v50  ;;  %v1031_v4 = vpack.c.bf16 %v2453_v61, %v2448_v51  ;;  %1506 = vmatprep.mubr.bf16.mxu1 %v1034_v62  ;;  %v2533_v10 = vunpack.i.h.bf16 %v2529_v3  ;;  %v2530_v11 = vunpack.i.l.bf16 %v2529_v3  ;;  %v1905_v50 = vld [vmem:[%s3006_s28 + $0x648] sm:$0xff]  ;;  %v1938_v60 = vld [vmem:[%s3006_s28 + $0x750] sm:$0xff]  ;;  %v1955_v3 = vld [vmem:[%s3006_s28 + $0x7d8] sm:$0xff] }
  0xee   : > { %2702 = vxpose.xlu0.b32.cont [5/16] (narrow) %v2701_v49, 64  ;;  %v2457_v9 = vpop.trf.xlu0  ;;  %1507 = vmatmul.mubr.bf16.gmra.mrb[20].mxu1 %v1033_v63  ;;  %v1921_v51 = vld [vmem:[%s3006_s28 + $0x6c8] sm:$0xff]  ;;  %v1954_v61 = vld [vmem:[%s3006_s28 + $0x7d0] sm:$0xff] }
  0xef   : > { %1345 = vmatprep.mubr.bf16.mxu0 %v1032_v2  ;;  %v2461_v14 = vunpack.i.h.bf16 %v2457_v9  ;;  %v2458_v15 = vunpack.i.l.bf16 %v2457_v9  ;;  %v2711_v59 = vpack.i.bf16 %v1905_v50, %v1921_v51  ;;  %v1906_v62 = vld [vmem:[%s3006_s28 + $0x650] sm:$0xff]  ;;  %v1939_v2 = vld [vmem:[%s3006_s28 + $0x758] sm:$0xff]  ;;  %v1956_v9 = vld [vmem:[%s3006_s28 + $0x7e0] sm:$0xff] }
  0xf0   : > { %1346 = vmatmul.mubr.bf16.gmra.mrb[20].mxu0 %v1031_v4  ;;  %2776 = vxpose.xlu1.b32.cont [6/16] (narrow) %v2775_v0, 64  ;;  %v2534_v16 = vpop.trf.xlu1  ;;  %v1922_v63 = vld [vmem:[%s3006_s28 + $0x6d0] sm:$0xff]  ;;  %v2785_v0 = vpack.i.bf16 %v1938_v60, %v1954_v61  ;;  %v1907_v4 = vld [vmem:[%s3006_s28 + $0x658] sm:$0xff]  ;;  %v2787_v6 = vpack.i.bf16 %v1939_v2, %v1955_v3 }
  0xf1   : > { %v2538_v20 = vunpack.i.h.bf16 %v2534_v16  ;;  %v2535_v21 = vunpack.i.l.bf16 %v2534_v16  ;;  %v2713_v1 = vpack.i.bf16 %v1906_v62, %v1922_v63  ;;  %v1909_v16 = vld [vmem:[%s3006_s28 + $0x668] sm:$0xff] }
  0xf2   : > { %2704 = vxpose.xlu0.b32.cont [6/16] (narrow) %v2703_v5, 64  ;;  %v2462_v19 = vpop.trf.xlu0  ;;  %v1923_v5 = vld [vmem:[%s3006_s28 + $0x6d8] sm:$0xff] }
  0xf3   : > { %v2466_v24 = vunpack.i.h.bf16 %v2462_v19  ;;  %v2463_v25 = vunpack.i.l.bf16 %v2462_v19  ;;  %v1038_v26 = vpack.c.bf16 %v2535_v21, %v2530_v11  ;;  %v1037_v27 = vpack.c.bf16 %v2538_v20, %v2533_v10  ;;  %v1908_v10 = vld [vmem:[%s3006_s28 + $0x660] sm:$0xff]  ;;  %v1942_v20 = vld [vmem:[%s3006_s28 + $0x770] sm:$0xff] }
  0xf4   : > { %2778 = vxpose.xlu1.b32.cont [7/16] (narrow) %v2777_v12, 64  ;;  %v2539_v31 = vpop.trf.xlu1  ;;  %v2715_v7 = vpack.i.bf16 %v1907_v4, %v1923_v5  ;;  %v1924_v11 = vld [vmem:[%s3006_s28 + $0x6e0] sm:$0xff]  ;;  %v2789_v12 = vpack.i.bf16 %v1940_v8, %v1956_v9  ;;  %v2719_v19 = vpack.i.bf16 %v1909_v16, %v1925_v17  ;;  %v1958_v21 = vld [vmem:[%s3006_s28 + $0x7f0] sm:$0xff] }
  0xf5   : > { %v1036_v30 = vpack.c.bf16 %v2466_v24, %v2461_v14  ;;  %v1035_v32 = vpack.c.bf16 %v2463_v25, %v2458_v15  ;;  %1514 = vmatprep.mubr.bf16.mxu1 %v1038_v26  ;;  %v2543_v38 = vunpack.i.h.bf16 %v2539_v31  ;;  %v2540_v39 = vunpack.i.l.bf16 %v2539_v31  ;;  %v1941_v14 = vld [vmem:[%s3006_s28 + $0x768] sm:$0xff]  ;;  %v1943_v26 = vld [vmem:[%s3006_s28 + $0x778] sm:$0xff] }
  0xf6   : > { %2706 = vxpose.xlu0.b32.cont [7/16] (narrow) %v2705_v13, 64  ;;  %v2467_v37 = vpop.trf.xlu0  ;;  %1515 = vmatmul.mubr.bf16.gmra.mrb[24].mxu1 %v1037_v27  ;;  %v2717_v13 = vpack.i.bf16 %v1908_v10, %v1924_v11  ;;  %v1957_v15 = vld [vmem:[%s3006_s28 + $0x7e8] sm:$0xff]  ;;  %v2793_v24 = vpack.i.bf16 %v1942_v20, %v1958_v21  ;;  %v2721_v25 = vpack.i.bf16 %v1910_v22, %v1926_v23  ;;  %v1959_v27 = vld [vmem:[%s3006_s28 + $0x7f8] sm:$0xff] }
  0xf7   : > { %1353 = vmatprep.mubr.bf16.mxu0 %v1036_v30  ;;  %v2471_v42 = vunpack.i.h.bf16 %v2467_v37  ;;  %v2468_v43 = vunpack.i.l.bf16 %v2467_v37  ;;  %v2791_v18 = vpack.i.bf16 %v1941_v14, %v1957_v15  ;;  %v2795_v30 = vpack.i.bf16 %v1943_v26, %v1959_v27 }
  0xf8   : > { %1354 = vmatmul.mubr.bf16.gmra.mrb[24].mxu0 %v1035_v32  ;;  %2780 = vxpose.xlu1.b32.cont [8/16] (narrow) %v2779_v28, 64  ;;  %v2544_v44 = vpop.trf.xlu1  ;;  %v1911_v28 = vld [vmem:[%s3006_s28 + $0x678] sm:$0xff] }
  0xf9   : > { %v2548_v48 = vunpack.i.h.bf16 %v2544_v44  ;;  %v2545_v49 = vunpack.i.l.bf16 %v2544_v44  ;;  %v2723_v31 = vpack.i.bf16 %v1911_v28, %v1927_v29 }
  0xfa   : > { %2708 = vxpose.xlu0.b32.cont [8/16] (narrow) %v2707_v33, 64  ;;  %v2472_v47 = vpop.trf.xlu0 }
  0xfb   : > { %v2476_v52 = vunpack.i.h.bf16 %v2472_v47  ;;  %v2473_v53 = vunpack.i.l.bf16 %v2472_v47  ;;  %v1042_v54 = vpack.c.bf16 %v2545_v49, %v2540_v39  ;;  %v1041_v55 = vpack.c.bf16 %v2548_v48, %v2543_v38 }
  0xfc   : > { %2782 = vxpose.xlu1.b32.cont [9/16] (narrow) %v2781_v40, 64 }
  0xfd   : > { %v1040_v57 = vpack.c.bf16 %v2476_v52, %v2471_v42  ;;  %v1039_v58 = vpack.c.bf16 %v2473_v53, %v2468_v43  ;;  %1522 = vmatprep.mubr.bf16.mxu1 %v1042_v54 }
  0xfe   : > { %2710 = vxpose.xlu0.b32.cont [9/16] (narrow) %v2709_v41, 64  ;;  %1523 = vmatmul.mubr.bf16.gmra.mrb[28].mxu1 %v1041_v55 }
  0xff   : > { %1361 = vmatprep.mubr.bf16.mxu0 %v1040_v57 }
 0x100   : > { %1362 = vmatmul.mubr.bf16.gmra.mrb[28].mxu0 %v1039_v58  ;;  %2784 = vxpose.xlu1.b32.cont [10/16] (narrow) %v2783_v56, 64 }
 0x102   : > { %2712 = vxpose.xlu0.b32.cont [10/16] (narrow) %v2711_v59, 64 }
 0x104   : > { %2786 = vxpose.xlu1.b32.cont [11/16] (narrow) %v2785_v0, 64 }
 0x106   : > { %2714 = vxpose.xlu0.b32.cont [11/16] (narrow) %v2713_v1, 64 }
 0x108   : > { %2788 = vxpose.xlu1.b32.cont [12/16] (narrow) %v2787_v6, 64 }
 0x10a   : > { %2716 = vxpose.xlu0.b32.cont [12/16] (narrow) %v2715_v7, 64 }
 0x10c   : > { %2790 = vxpose.xlu1.b32.cont [13/16] (narrow) %v2789_v12, 64 }
 0x10e   : > { %2718 = vxpose.xlu0.b32.cont [13/16] (narrow) %v2717_v13, 64 }
 0x110   : > { %2792 = vxpose.xlu1.b32.cont [14/16] (narrow) %v2791_v18, 64 }
 0x112   : > { %2720 = vxpose.xlu0.b32.cont [14/16] (narrow) %v2719_v19, 64 }
 0x114   : > { %2794 = vxpose.xlu1.b32.cont [15/16] (narrow) %v2793_v24, 64 }
 0x116   : > { %2722 = vxpose.xlu0.b32.cont [15/16] (narrow) %v2721_v25, 64 }
 0x118   : > { %2796 = vxpose.xlu1.b32.end [16/16] (narrow) %v2795_v30, 64 }
 0x11a   : > { %2724 = vxpose.xlu0.b32.end [16/16] (narrow) %v2723_v31, 64 }
 0x11c   : > { %v2653_v32 = vpop.trf.xlu1 }
 0x11d   : > { %v2657_v34 = vunpack.i.h.bf16 %v2653_v32  ;;  %v2654_v35 = vunpack.i.l.bf16 %v2653_v32 }
 0x11e   : > { %v2581_v33 = vpop.trf.xlu0 }
 0x11f   : > { %v2585_v36 = vunpack.i.h.bf16 %v2581_v33  ;;  %v2582_v37 = vunpack.i.l.bf16 %v2581_v33 }
 0x120   : > { %v2658_v38 = vpop.trf.xlu1 }
 0x121   : > { %v2662_v40 = vunpack.i.h.bf16 %v2658_v38  ;;  %v2659_v41 = vunpack.i.l.bf16 %v2658_v38 }
 0x122   : > { %v2586_v39 = vpop.trf.xlu0 }
 0x123   : > { %v2590_v42 = vunpack.i.h.bf16 %v2586_v39  ;;  %v2587_v43 = vunpack.i.l.bf16 %v2586_v39  ;;  %v1046_v44 = vpack.c.bf16 %v2659_v41, %v2654_v35  ;;  %v1045_v45 = vpack.c.bf16 %v2662_v40, %v2657_v34 }
 0x124   : > { %v2663_v47 = vpop.trf.xlu1 }
 0x125   : > { %v1044_v46 = vpack.c.bf16 %v2587_v43, %v2582_v37  ;;  %v1043_v48 = vpack.c.bf16 %v2590_v42, %v2585_v36  ;;  %1530 = vmatprep.mubr.bf16.mxu1 %v1046_v44  ;;  %v2667_v50 = vunpack.i.h.bf16 %v2663_v47  ;;  %v2664_v51 = vunpack.i.l.bf16 %v2663_v47 }
 0x126   : > { %v2591_v49 = vpop.trf.xlu0  ;;  %1531 = vmatmul.mubr.bf16.gmra.mrb[32].mxu1 %v1045_v45 }
 0x127   : > { %1369 = vmatprep.mubr.bf16.mxu0 %v1044_v46  ;;  %v2595_v52 = vunpack.i.h.bf16 %v2591_v49  ;;  %v2592_v53 = vunpack.i.l.bf16 %v2591_v49 }
 0x128   : > { %1370 = vmatmul.mubr.bf16.gmra.mrb[32].mxu0 %v1043_v48  ;;  %v2668_v54 = vpop.trf.xlu1 }
 0x129   : > { %v2672_v56 = vunpack.i.h.bf16 %v2668_v54  ;;  %v2669_v57 = vunpack.i.l.bf16 %v2668_v54 }
 0x12a   : > { %v2596_v55 = vpop.trf.xlu0 }
 0x12b   : > { %v2600_v58 = vunpack.i.h.bf16 %v2596_v55  ;;  %v2597_v59 = vunpack.i.l.bf16 %v2596_v55  ;;  %v1050_v60 = vpack.c.bf16 %v2669_v57, %v2664_v51  ;;  %v1049_v61 = vpack.c.bf16 %v2672_v56, %v2667_v50 }
 0x12c   : > { %v2673_v63 = vpop.trf.xlu1 }
 0x12d   : > { %v1048_v62 = vpack.c.bf16 %v2597_v59, %v2592_v53  ;;  %v1047_v0 = vpack.c.bf16 %v2600_v58, %v2595_v52  ;;  %1538 = vmatprep.mubr.bf16.mxu1 %v1050_v60  ;;  %v2677_v2 = vunpack.i.h.bf16 %v2673_v63  ;;  %v2674_v3 = vunpack.i.l.bf16 %v2673_v63 }
 0x12e   : > { %v2601_v1 = vpop.trf.xlu0  ;;  %1539 = vmatmul.mubr.bf16.gmra.mrb[36].mxu1 %v1049_v61 }
 0x12f   : > { %1377 = vmatprep.mubr.bf16.mxu0 %v1048_v62  ;;  %v2605_v4 = vunpack.i.h.bf16 %v2601_v1  ;;  %v2602_v5 = vunpack.i.l.bf16 %v2601_v1 }
 0x130   : > { %1378 = vmatmul.mubr.bf16.gmra.mrb[36].mxu0 %v1047_v0  ;;  %v2678_v6 = vpop.trf.xlu1 }
 0x131   : > { %v2682_v8 = vunpack.i.h.bf16 %v2678_v6  ;;  %v2679_v9 = vunpack.i.l.bf16 %v2678_v6 }
 0x132   : > { %v2606_v7 = vpop.trf.xlu0 }
 0x133   : > { %v2610_v10 = vunpack.i.h.bf16 %v2606_v7  ;;  %v2607_v11 = vunpack.i.l.bf16 %v2606_v7  ;;  %v1054_v12 = vpack.c.bf16 %v2679_v9, %v2674_v3  ;;  %v1053_v13 = vpack.c.bf16 %v2682_v8, %v2677_v2 }
 0x134   : > { %v2683_v15 = vpop.trf.xlu1 }
 0x135   : > { %v1052_v14 = vpack.c.bf16 %v2607_v11, %v2602_v5  ;;  %v1051_v16 = vpack.c.bf16 %v2610_v10, %v2605_v4  ;;  %1546 = vmatprep.mubr.bf16.mxu1 %v1054_v12  ;;  %v2687_v18 = vunpack.i.h.bf16 %v2683_v15  ;;  %v2684_v19 = vunpack.i.l.bf16 %v2683_v15 }
 0x136   : > { %v2611_v17 = vpop.trf.xlu0  ;;  %1547 = vmatmul.mubr.bf16.gmra.mrb[40].mxu1 %v1053_v13 }
 0x137   : > { %1385 = vmatprep.mubr.bf16.mxu0 %v1052_v14  ;;  %v2615_v20 = vunpack.i.h.bf16 %v2611_v17  ;;  %v2612_v21 = vunpack.i.l.bf16 %v2611_v17 }
 0x138   : > { %1386 = vmatmul.mubr.bf16.gmra.mrb[40].mxu0 %v1051_v16  ;;  %v2688_v22 = vpop.trf.xlu1 }
 0x139   : > { %v2692_v24 = vunpack.i.h.bf16 %v2688_v22  ;;  %v2689_v25 = vunpack.i.l.bf16 %v2688_v22 }
 0x13a   : > { %v2616_v23 = vpop.trf.xlu0 }
 0x13b   : > { %v2620_v26 = vunpack.i.h.bf16 %v2616_v23  ;;  %v2617_v27 = vunpack.i.l.bf16 %v2616_v23  ;;  %v1058_v28 = vpack.c.bf16 %v2689_v25, %v2684_v19  ;;  %v1057_v29 = vpack.c.bf16 %v2692_v24, %v2687_v18 }
 0x13d   : > { %v1056_v30 = vpack.c.bf16 %v2617_v27, %v2612_v21  ;;  %v1055_v31 = vpack.c.bf16 %v2620_v26, %v2615_v20  ;;  %1554 = vmatprep.mubr.bf16.mxu1 %v1058_v28 }
 0x13e   : > { %1555 = vmatmul.mubr.bf16.gmra.mrb[44].mxu1 %v1057_v29 }
 0x13f   : > { %1393 = vmatprep.mubr.bf16.mxu0 %v1056_v30 }
 0x140   : > { %1394 = vmatmul.mubr.bf16.gmra.mrb[44].mxu0 %v1055_v31 }
 0x15c   : > { %v2797_v32 = vpop.trf.xlu1 }
 0x15d   : > { %v2801_v34 = vunpack.i.h.bf16 %v2797_v32  ;;  %v2798_v35 = vunpack.i.l.bf16 %v2797_v32 }
 0x15e   : > { %v2725_v33 = vpop.trf.xlu0 }
 0x15f   : > { %v2729_v36 = vunpack.i.h.bf16 %v2725_v33  ;;  %v2726_v37 = vunpack.i.l.bf16 %v2725_v33  ;;  %v3363_v33 = vld [vmem:[%s3457_s2] ss:$0 sm:$0xff] }
 0x160   : > { %v2802_v38 = vpop.trf.xlu1 }
 0x161   : > { %v2806_v39 = vunpack.i.h.bf16 %v2802_v38  ;;  %v2803_v40 = vunpack.i.l.bf16 %v2802_v38 }
 0x162   : > { %v2730_v41 = vpop.trf.xlu0 }
 0x163   : > { %v2734_v42 = vunpack.i.h.bf16 %v2730_v41  ;;  %v2731_v43 = vunpack.i.l.bf16 %v2730_v41  ;;  %v1062_v44 = vpack.c.bf16 %v2803_v40, %v2798_v35  ;;  %v1061_v45 = vpack.c.bf16 %v2806_v39, %v2801_v34 }
 0x164   : > { %v2807_v46 = vpop.trf.xlu1 }
 0x165   : > { %v1060_v47 = vpack.c.bf16 %v2731_v43, %v2726_v37  ;;  %v1059_v48 = vpack.c.bf16 %v2734_v42, %v2729_v36  ;;  %1562 = vmatprep.mubr.bf16.mxu1 %v1062_v44  ;;  %v2811_v50 = vunpack.i.h.bf16 %v2807_v46  ;;  %v2808_v51 = vunpack.i.l.bf16 %v2807_v46 }
 0x166   : > { %v2735_v49 = vpop.trf.xlu0  ;;  %1563 = vmatmul.mubr.bf16.gmra.mrb[48].mxu1 %v1061_v45 }
 0x167   : > { %1401 = vmatprep.mubr.bf16.mxu0 %v1060_v47  ;;  %v2739_v52 = vunpack.i.h.bf16 %v2735_v49  ;;  %v2736_v53 = vunpack.i.l.bf16 %v2735_v49 }
 0x168   : > { %1402 = vmatmul.mubr.bf16.gmra.mrb[48].mxu0 %v1059_v48  ;;  %v2812_v54 = vpop.trf.xlu1 }
 0x169   : > { %v2816_v55 = vunpack.i.h.bf16 %v2812_v54  ;;  %v2813_v56 = vunpack.i.l.bf16 %v2812_v54 }
 0x16a   : > { %v2740_v57 = vpop.trf.xlu0 }
 0x16b   : > { %v2744_v58 = vunpack.i.h.bf16 %v2740_v57  ;;  %v2741_v59 = vunpack.i.l.bf16 %v2740_v57  ;;  %v1066_v60 = vpack.c.bf16 %v2813_v56, %v2808_v51  ;;  %v1065_v61 = vpack.c.bf16 %v2816_v55, %v2811_v50 }
 0x16c   : > { %v2817_v62 = vpop.trf.xlu1 }
 0x16d   : > { %v1064_v63 = vpack.c.bf16 %v2741_v59, %v2736_v53  ;;  %v1063_v0 = vpack.c.bf16 %v2744_v58, %v2739_v52  ;;  %1570 = vmatprep.mubr.bf16.mxu1 %v1066_v60  ;;  %v2821_v2 = vunpack.i.h.bf16 %v2817_v62  ;;  %v2818_v3 = vunpack.i.l.bf16 %v2817_v62 }
 0x16e   : > { %v2745_v1 = vpop.trf.xlu0  ;;  %1571 = vmatmul.mubr.bf16.gmra.mrb[52].mxu1 %v1065_v61 }
 0x16f   : > { %1409 = vmatprep.mubr.bf16.mxu0 %v1064_v63  ;;  %v2749_v4 = vunpack.i.h.bf16 %v2745_v1  ;;  %v2746_v5 = vunpack.i.l.bf16 %v2745_v1 }
 0x170   : > { %1410 = vmatmul.mubr.bf16.gmra.mrb[52].mxu0 %v1063_v0  ;;  %v2822_v6 = vpop.trf.xlu1 }
 0x171   : > { %v2826_v7 = vunpack.i.h.bf16 %v2822_v6  ;;  %v2823_v8 = vunpack.i.l.bf16 %v2822_v6 }
 0x172   : > { %v2750_v9 = vpop.trf.xlu0 }
 0x173   : > { %v2754_v10 = vunpack.i.h.bf16 %v2750_v9  ;;  %v2751_v11 = vunpack.i.l.bf16 %v2750_v9  ;;  %v1070_v12 = vpack.c.bf16 %v2823_v8, %v2818_v3  ;;  %v1069_v13 = vpack.c.bf16 %v2826_v7, %v2821_v2 }
 0x174   : > { %v2827_v14 = vpop.trf.xlu1 }
 0x175   : > { %v1068_v15 = vpack.c.bf16 %v2751_v11, %v2746_v5  ;;  %v1067_v16 = vpack.c.bf16 %v2754_v10, %v2749_v4  ;;  %1578 = vmatprep.mubr.bf16.mxu1 %v1070_v12  ;;  %v2831_v18 = vunpack.i.h.bf16 %v2827_v14  ;;  %v2828_v19 = vunpack.i.l.bf16 %v2827_v14 }
 0x176   : > { %v2755_v17 = vpop.trf.xlu0  ;;  %1579 = vmatmul.mubr.bf16.gmra.mrb[56].mxu1 %v1069_v13 }
 0x177   : > { %1417 = vmatprep.mubr.bf16.mxu0 %v1068_v15  ;;  %v2759_v20 = vunpack.i.h.bf16 %v2755_v17  ;;  %v2756_v21 = vunpack.i.l.bf16 %v2755_v17 }
 0x178   : > { %1418 = vmatmul.mubr.bf16.gmra.mrb[56].mxu0 %v1067_v16  ;;  %v2832_v22 = vpop.trf.xlu1 }
 0x179   : > { %v2836_v23 = vunpack.i.h.bf16 %v2832_v22  ;;  %v2833_v24 = vunpack.i.l.bf16 %v2832_v22  ;;  %v2126_v26 = vpop.f32.mrb[0].mxu1 }
 0x17a   : > { %v2760_v25 = vpop.trf.xlu0  ;;  %v2127_v30 = vpop.f32.mrb[1].mxu1 }
 0x17b   : > { %v2764_v27 = vunpack.i.h.bf16 %v2760_v25  ;;  %v2761_v28 = vunpack.i.l.bf16 %v2760_v25  ;;  %v2014_v29 = vpop.f32.mrb[0].mxu0  ;;  %v1074_v31 = vpack.c.bf16 %v2833_v24, %v2828_v19  ;;  %v1073_v32 = vpack.c.bf16 %v2836_v23, %v2831_v18  ;;  %v2129_v36 = vpop.f32.mrb[2].mxu1 }
 0x17c   : > { %v2015_v34 = vpop.f32.mrb[1].mxu0  ;;  %v2128_v35 = vadd.f32 %v2127_v30, %v2126_v26  ;;  %v2130_v41 = vpop.f32.mrb[3].mxu1 }
 0x17d   : > { %v1072_v37 = vpack.c.bf16 %v2761_v28, %v2756_v21  ;;  %v1071_v38 = vpack.c.bf16 %v2764_v27, %v2759_v20  ;;  %v2016_v39 = vadd.f32 %v2015_v34, %v2014_v29  ;;  %v2017_v40 = vpop.f32.mrb[2].mxu0  ;;  %1586 = vmatprep.mubr.bf16.mxu1 %v1074_v31  ;;  %v2131_v43 = vadd.f32 %v2130_v41, %v2129_v36 }
 0x17e   : > { %v2018_v42 = vpop.f32.mrb[3].mxu0  ;;  %1587 = vmatmul.mubr.bf16.gmra.mrb[60].mxu1 %v1073_v32 }
 0x17f   : > { %1425 = vmatprep.mubr.bf16.mxu0 %v1072_v37  ;;  %v1308_v44 = vadd.f32 %v2016_v39, %v3363_v33  ;;  %v2019_v45 = vadd.f32 %v2018_v42, %v2017_v40 }
 0x180   : > { %1426 = vmatmul.mubr.bf16.gmra.mrb[60].mxu0 %v1071_v38 }
 0x181   : > { %v1311_v46 = vadd.f32 %v2019_v45, %v3363_v33  ;;  %v1469_v47 = vadd.f32 %v2128_v35, %v1308_v44  ;;  %v2132_v48 = vpop.f32.mrb[4].mxu1 }
 0x182   : > { %v2133_v52 = vpop.f32.mrb[5].mxu1 }
 0x183   : > { %v1595_v49 = vmax.f32 %v1469_v47, 0.0  ;;  %v2020_v50 = vpop.f32.mrb[4].mxu0  ;;  %v1472_v51 = vadd.f32 %v2131_v43, %v1311_v46  ;;  %v2134_v54 = vadd.f32 %v2133_v52, %v2132_v48  ;;  %v2135_v55 = vpop.f32.mrb[6].mxu1 }
 0x184   : > { %v2021_v53 = vpop.f32.mrb[5].mxu0  ;;  %v2136_v59 = vpop.f32.mrb[7].mxu1 }
 0x185   : > { %v2022_v56 = vadd.f32 %v2021_v53, %v2020_v50  ;;  %v1596_v57 = vmax.f32 %v1472_v51, 0.0  ;;  %v2023_v58 = vpop.f32.mrb[6].mxu0  ;;  %v2137_v61 = vadd.f32 %v2136_v59, %v2135_v55 }
 0x186   : > { %v2024_v60 = vpop.f32.mrb[7].mxu0 }
 0x187   : > { %v1316_v62 = vadd.f32 %v2022_v56, %v3363_v33  ;;  %v1627_v63 = vadd.f32 %v1596_v57, %v1595_v49  ;;  %v2025_v0 = vadd.f32 %v2024_v60, %v2023_v58 }
 0x189   : > { %v1319_v1 = vadd.f32 %v2025_v0, %v3363_v33  ;;  %v1477_v2 = vadd.f32 %v2134_v54, %v1316_v62  ;;  %v2138_v3 = vpop.f32.mrb[8].mxu1 }
 0x18a   : > { %v2139_v7 = vpop.f32.mrb[9].mxu1 }
 0x18b   : > { %v1597_v4 = vmax.f32 %v1477_v2, 0.0  ;;  %v2026_v5 = vpop.f32.mrb[8].mxu0  ;;  %v1480_v6 = vadd.f32 %v2137_v61, %v1319_v1  ;;  %v2140_v9 = vadd.f32 %v2139_v7, %v2138_v3  ;;  %v2141_v10 = vpop.f32.mrb[10].mxu1 }
 0x18c   : > { %v2027_v8 = vpop.f32.mrb[9].mxu0  ;;  %v2142_v15 = vpop.f32.mrb[11].mxu1 }
 0x18d   : > { %v1628_v11 = vadd.f32 %v1627_v63, %v1597_v4  ;;  %v2028_v12 = vadd.f32 %v2027_v8, %v2026_v5  ;;  %v1598_v13 = vmax.f32 %v1480_v6, 0.0  ;;  %v2029_v14 = vpop.f32.mrb[10].mxu0  ;;  %v2143_v17 = vadd.f32 %v2142_v15, %v2141_v10 }
 0x18e   : > { %v2030_v16 = vpop.f32.mrb[11].mxu0 }
 0x18f   : > { %v1324_v18 = vadd.f32 %v2028_v12, %v3363_v33  ;;  %v1629_v19 = vadd.f32 %v1628_v11, %v1598_v13  ;;  %v2031_v20 = vadd.f32 %v2030_v16, %v2029_v14 }
 0x191   : > { %v1327_v21 = vadd.f32 %v2031_v20, %v3363_v33  ;;  %v1485_v22 = vadd.f32 %v2140_v9, %v1324_v18  ;;  %v2144_v23 = vpop.f32.mrb[12].mxu1 }
 0x192   : > { %v2145_v27 = vpop.f32.mrb[13].mxu1 }
 0x193   : > { %v1599_v24 = vmax.f32 %v1485_v22, 0.0  ;;  %v2032_v25 = vpop.f32.mrb[12].mxu0  ;;  %v1488_v26 = vadd.f32 %v2143_v17, %v1327_v21  ;;  %v2146_v29 = vadd.f32 %v2145_v27, %v2144_v23  ;;  %v2147_v30 = vpop.f32.mrb[14].mxu1 }
 0x194   : > { %v2033_v28 = vpop.f32.mrb[13].mxu0  ;;  %v2148_v36 = vpop.f32.mrb[15].mxu1 }
 0x195   : > { %v1630_v31 = vadd.f32 %v1629_v19, %v1599_v24  ;;  %v2034_v32 = vadd.f32 %v2033_v28, %v2032_v25  ;;  %v1600_v34 = vmax.f32 %v1488_v26, 0.0  ;;  %v2035_v35 = vpop.f32.mrb[14].mxu0  ;;  %v2149_v38 = vadd.f32 %v2148_v36, %v2147_v30 }
 0x196   : > { %v2036_v37 = vpop.f32.mrb[15].mxu0 }
 0x197   : > { %v1332_v39 = vadd.f32 %v2034_v32, %v3363_v33  ;;  %v1631_v40 = vadd.f32 %v1630_v31, %v1600_v34  ;;  %v2037_v41 = vadd.f32 %v2036_v37, %v2035_v35 }
 0x199   : > { %v1335_v42 = vadd.f32 %v2037_v41, %v3363_v33  ;;  %v1493_v43 = vadd.f32 %v2146_v29, %v1332_v39 }
 0x19b   : > { %v1601_v44 = vmax.f32 %v1493_v43, 0.0  ;;  %v1496_v45 = vadd.f32 %v2149_v38, %v1335_v42 }
 0x19d   : > { %v1632_v46 = vadd.f32 %v1631_v40, %v1601_v44  ;;  %v1602_v47 = vmax.f32 %v1496_v45, 0.0 }
 0x19f   : > { %v1633_v48 = vadd.f32 %v1632_v46, %v1602_v47 }
 0x1a1   : > { %v1634_v49 = vrot.slane %v1633_v48, 4 }
 0x1a3   : > { %v1635_v50 = vadd.f32 %v1634_v49, %v1633_v48 }
 0x1a5   : > { %v1636_v51 = vrot.slane %v1635_v50, 2 }
 0x1a7   : > { %v1637_v52 = vadd.f32 %v1636_v51, %v1635_v50 }
 0x1a9   : > { %v1638_v53 = vrot.slane %v1637_v52, 1 }
 0x1ab   : > { %v1639_v54 = vadd.f32 %v1638_v53, %v1637_v52 }
 0x1ad   : > { %v1640_v55 = vmul.f32 0.015625, %v1639_v54 }
 0x1af   : > { %1641 = vst [vmem:[%s3376_s27] sm:$0x1] %v1640_v55 }
 0x1b9   : > { %v2150_v56 = vpop.f32.mrb[16].mxu1 }
 0x1ba   : > { %v2151_v58 = vpop.f32.mrb[17].mxu1 }
 0x1bb   : > { %v2038_v57 = vpop.f32.mrb[16].mxu0  ;;  %v2152_v60 = vadd.f32 %v2151_v58, %v2150_v56  ;;  %v2153_v61 = vpop.f32.mrb[18].mxu1 }
 0x1bc   : > { %v2039_v59 = vpop.f32.mrb[17].mxu0  ;;  %v2154_v0 = vpop.f32.mrb[19].mxu1 }
 0x1bd   : > { %v2040_v62 = vadd.f32 %v2039_v59, %v2038_v57  ;;  %v2041_v63 = vpop.f32.mrb[18].mxu0  ;;  %v2155_v2 = vadd.f32 %v2154_v0, %v2153_v61 }
 0x1be   : > { %v2042_v1 = vpop.f32.mrb[19].mxu0 }
 0x1bf   : > { %v1340_v3 = vadd.f32 %v2040_v62, %v3363_v33  ;;  %v2043_v4 = vadd.f32 %v2042_v1, %v2041_v63 }
 0x1c1   : > { %v1343_v5 = vadd.f32 %v2043_v4, %v3363_v33  ;;  %v1501_v6 = vadd.f32 %v2152_v60, %v1340_v3  ;;  %v2156_v7 = vpop.f32.mrb[20].mxu1 }
 0x1c2   : > { %v2157_v11 = vpop.f32.mrb[21].mxu1 }
 0x1c3   : > { %v1603_v8 = vmax.f32 %v1501_v6, 0.0  ;;  %v2044_v9 = vpop.f32.mrb[20].mxu0  ;;  %v1504_v10 = vadd.f32 %v2155_v2, %v1343_v5  ;;  %v2158_v13 = vadd.f32 %v2157_v11, %v2156_v7  ;;  %v2159_v14 = vpop.f32.mrb[22].mxu1 }
 0x1c4   : > { %v2045_v12 = vpop.f32.mrb[21].mxu0  ;;  %v2160_v18 = vpop.f32.mrb[23].mxu1 }
 0x1c5   : > { %v2046_v15 = vadd.f32 %v2045_v12, %v2044_v9  ;;  %v1604_v16 = vmax.f32 %v1504_v10, 0.0  ;;  %v2047_v17 = vpop.f32.mrb[22].mxu0  ;;  %v2161_v20 = vadd.f32 %v2160_v18, %v2159_v14 }
 0x1c6   : > { %v2048_v19 = vpop.f32.mrb[23].mxu0 }
 0x1c7   : > { %v1348_v21 = vadd.f32 %v2046_v15, %v3363_v33  ;;  %v1642_v22 = vadd.f32 %v1604_v16, %v1603_v8  ;;  %v2049_v23 = vadd.f32 %v2048_v19, %v2047_v17 }
 0x1c9   : > { %v1351_v24 = vadd.f32 %v2049_v23, %v3363_v33  ;;  %v1509_v25 = vadd.f32 %v2158_v13, %v1348_v21  ;;  %v2162_v26 = vpop.f32.mrb[24].mxu1 }
 0x1ca   : > { %v2163_v30 = vpop.f32.mrb[25].mxu1 }
 0x1cb   : > { %v1605_v27 = vmax.f32 %v1509_v25, 0.0  ;;  %v2050_v28 = vpop.f32.mrb[24].mxu0  ;;  %v1512_v29 = vadd.f32 %v2161_v20, %v1351_v24  ;;  %v2164_v32 = vadd.f32 %v2163_v30, %v2162_v26  ;;  %v2165_v34 = vpop.f32.mrb[26].mxu1 }
 0x1cc   : > { %v2051_v31 = vpop.f32.mrb[25].mxu0  ;;  %v2166_v39 = vpop.f32.mrb[27].mxu1 }
 0x1cd   : > { %v1643_v35 = vadd.f32 %v1642_v22, %v1605_v27  ;;  %v2052_v36 = vadd.f32 %v2051_v31, %v2050_v28  ;;  %v1606_v37 = vmax.f32 %v1512_v29, 0.0  ;;  %v2053_v38 = vpop.f32.mrb[26].mxu0  ;;  %v2167_v41 = vadd.f32 %v2166_v39, %v2165_v34 }
 0x1ce   : > { %v2054_v40 = vpop.f32.mrb[27].mxu0 }
 0x1cf   : > { %v1356_v42 = vadd.f32 %v2052_v36, %v3363_v33  ;;  %v1644_v43 = vadd.f32 %v1643_v35, %v1606_v37  ;;  %v2055_v44 = vadd.f32 %v2054_v40, %v2053_v38 }
 0x1d1   : > { %v1359_v45 = vadd.f32 %v2055_v44, %v3363_v33  ;;  %v1517_v46 = vadd.f32 %v2164_v32, %v1356_v42  ;;  %v2168_v47 = vpop.f32.mrb[28].mxu1 }
 0x1d2   : > { %v2169_v51 = vpop.f32.mrb[29].mxu1 }
 0x1d3   : > { %v1607_v48 = vmax.f32 %v1517_v46, 0.0  ;;  %v2056_v49 = vpop.f32.mrb[28].mxu0  ;;  %v1520_v50 = vadd.f32 %v2167_v41, %v1359_v45  ;;  %v2170_v53 = vadd.f32 %v2169_v51, %v2168_v47  ;;  %v2171_v54 = vpop.f32.mrb[30].mxu1 }
 0x1d4   : > { %v2057_v52 = vpop.f32.mrb[29].mxu0  ;;  %v2172_v59 = vpop.f32.mrb[31].mxu1 }
 0x1d5   : > { %v1645_v55 = vadd.f32 %v1644_v43, %v1607_v48  ;;  %v2058_v56 = vadd.f32 %v2057_v52, %v2056_v49  ;;  %v1608_v57 = vmax.f32 %v1520_v50, 0.0  ;;  %v2059_v58 = vpop.f32.mrb[30].mxu0  ;;  %v2173_v61 = vadd.f32 %v2172_v59, %v2171_v54 }
 0x1d6   : > { %v2060_v60 = vpop.f32.mrb[31].mxu0 }
 0x1d7   : > { %v1364_v62 = vadd.f32 %v2058_v56, %v3363_v33  ;;  %v1646_v63 = vadd.f32 %v1645_v55, %v1608_v57  ;;  %v2061_v0 = vadd.f32 %v2060_v60, %v2059_v58 }
 0x1d9   : > { %v1367_v1 = vadd.f32 %v2061_v0, %v3363_v33  ;;  %v1525_v2 = vadd.f32 %v2170_v53, %v1364_v62 }
 0x1db   : > { %v1609_v3 = vmax.f32 %v1525_v2, 0.0  ;;  %v1528_v4 = vadd.f32 %v2173_v61, %v1367_v1 }
 0x1dd   : > { %v1647_v5 = vadd.f32 %v1646_v63, %v1609_v3  ;;  %v1610_v6 = vmax.f32 %v1528_v4, 0.0 }
 0x1df   : > { %v1648_v7 = vadd.f32 %v1647_v5, %v1610_v6 }
 0x1e1   : > { %v1649_v8 = vrot.slane %v1648_v7, 4 }
 0x1e3   : > { %v1650_v9 = vadd.f32 %v1649_v8, %v1648_v7 }
 0x1e5   : > { %v1651_v10 = vrot.slane %v1650_v9, 2 }
 0x1e7   : > { %v1652_v11 = vadd.f32 %v1651_v10, %v1650_v9 }
 0x1e9   : > { %v1653_v12 = vrot.slane %v1652_v11, 1 }
 0x1eb   : > { %v1654_v13 = vadd.f32 %v1653_v12, %v1652_v11 }
 0x1ed   : > { %v1655_v14 = vmul.f32 0.015625, %v1654_v13 }
 0x1ef   : > { %1656 = vst [vmem:[%s3376_s27 + $0x1] sm:$0x1] %v1655_v14 }
 0x1f9   : > { %v2174_v15 = vpop.f32.mrb[32].mxu1 }
 0x1fa   : > { %v2175_v17 = vpop.f32.mrb[33].mxu1 }
 0x1fb   : > { %v2062_v16 = vpop.f32.mrb[32].mxu0  ;;  %v2176_v19 = vadd.f32 %v2175_v17, %v2174_v15  ;;  %v2177_v20 = vpop.f32.mrb[34].mxu1 }
 0x1fc   : > { %v2063_v18 = vpop.f32.mrb[33].mxu0  ;;  %v2178_v23 = vpop.f32.mrb[35].mxu1 }
 0x1fd   : > { %v2064_v21 = vadd.f32 %v2063_v18, %v2062_v16  ;;  %v2065_v22 = vpop.f32.mrb[34].mxu0  ;;  %v2179_v25 = vadd.f32 %v2178_v23, %v2177_v20 }
 0x1fe   : > { %v2066_v24 = vpop.f32.mrb[35].mxu0 }
 0x1ff   : > { %v1372_v26 = vadd.f32 %v2064_v21, %v3363_v33  ;;  %v2067_v27 = vadd.f32 %v2066_v24, %v2065_v22 }
 0x201   : > { %v1375_v28 = vadd.f32 %v2067_v27, %v3363_v33  ;;  %v1533_v29 = vadd.f32 %v2176_v19, %v1372_v26  ;;  %v2180_v30 = vpop.f32.mrb[36].mxu1 }
 0x202   : > { %v2181_v35 = vpop.f32.mrb[37].mxu1 }
 0x203   : > { %v1611_v31 = vmax.f32 %v1533_v29, 0.0  ;;  %v2068_v32 = vpop.f32.mrb[36].mxu0  ;;  %v1536_v34 = vadd.f32 %v2179_v25, %v1375_v28  ;;  %v2182_v37 = vadd.f32 %v2181_v35, %v2180_v30  ;;  %v2183_v38 = vpop.f32.mrb[38].mxu1 }
 0x204   : > { %v2069_v36 = vpop.f32.mrb[37].mxu0  ;;  %v2184_v42 = vpop.f32.mrb[39].mxu1 }
 0x205   : > { %v2070_v39 = vadd.f32 %v2069_v36, %v2068_v32  ;;  %v1612_v40 = vmax.f32 %v1536_v34, 0.0  ;;  %v2071_v41 = vpop.f32.mrb[38].mxu0  ;;  %v2185_v44 = vadd.f32 %v2184_v42, %v2183_v38 }
 0x206   : > { %v2072_v43 = vpop.f32.mrb[39].mxu0 }
 0x207   : > { %v1380_v45 = vadd.f32 %v2070_v39, %v3363_v33  ;;  %v1657_v46 = vadd.f32 %v1612_v40, %v1611_v31  ;;  %v2073_v47 = vadd.f32 %v2072_v43, %v2071_v41 }
 0x209   : > { %v1383_v48 = vadd.f32 %v2073_v47, %v3363_v33  ;;  %v1541_v49 = vadd.f32 %v2182_v37, %v1380_v45  ;;  %v2186_v50 = vpop.f32.mrb[40].mxu1 }
 0x20a   : > { %v2187_v54 = vpop.f32.mrb[41].mxu1 }
 0x20b   : > { %v1613_v51 = vmax.f32 %v1541_v49, 0.0  ;;  %v2074_v52 = vpop.f32.mrb[40].mxu0  ;;  %v1544_v53 = vadd.f32 %v2185_v44, %v1383_v48  ;;  %v2188_v56 = vadd.f32 %v2187_v54, %v2186_v50  ;;  %v2189_v57 = vpop.f32.mrb[42].mxu1 }
 0x20c   : > { %v2075_v55 = vpop.f32.mrb[41].mxu0  ;;  %v2190_v62 = vpop.f32.mrb[43].mxu1 }
 0x20d   : > { %v1658_v58 = vadd.f32 %v1657_v46, %v1613_v51  ;;  %v2076_v59 = vadd.f32 %v2075_v55, %v2074_v52  ;;  %v1614_v60 = vmax.f32 %v1544_v53, 0.0  ;;  %v2077_v61 = vpop.f32.mrb[42].mxu0  ;;  %v2191_v0 = vadd.f32 %v2190_v62, %v2189_v57 }
 0x20e   : > { %v2078_v63 = vpop.f32.mrb[43].mxu0 }
 0x20f   : > { %v1388_v1 = vadd.f32 %v2076_v59, %v3363_v33  ;;  %v1659_v2 = vadd.f32 %v1658_v58, %v1614_v60  ;;  %v2079_v3 = vadd.f32 %v2078_v63, %v2077_v61 }
 0x211   : > { %v1391_v4 = vadd.f32 %v2079_v3, %v3363_v33  ;;  %v1549_v5 = vadd.f32 %v2188_v56, %v1388_v1  ;;  %v2192_v6 = vpop.f32.mrb[44].mxu1 }
 0x212   : > { %v2193_v10 = vpop.f32.mrb[45].mxu1 }
 0x213   : > { %v1615_v7 = vmax.f32 %v1549_v5, 0.0  ;;  %v2080_v8 = vpop.f32.mrb[44].mxu0  ;;  %v1552_v9 = vadd.f32 %v2191_v0, %v1391_v4  ;;  %v2194_v12 = vadd.f32 %v2193_v10, %v2192_v6  ;;  %v2195_v13 = vpop.f32.mrb[46].mxu1 }
 0x214   : > { %v2081_v11 = vpop.f32.mrb[45].mxu0  ;;  %v2196_v18 = vpop.f32.mrb[47].mxu1 }
 0x215   : > { %v1660_v14 = vadd.f32 %v1659_v2, %v1615_v7  ;;  %v2082_v15 = vadd.f32 %v2081_v11, %v2080_v8  ;;  %v1616_v16 = vmax.f32 %v1552_v9, 0.0  ;;  %v2083_v17 = vpop.f32.mrb[46].mxu0  ;;  %v2197_v20 = vadd.f32 %v2196_v18, %v2195_v13 }
 0x216   : > { %v2084_v19 = vpop.f32.mrb[47].mxu0 }
 0x217   : > { %v1396_v21 = vadd.f32 %v2082_v15, %v3363_v33  ;;  %v1661_v22 = vadd.f32 %v1660_v14, %v1616_v16  ;;  %v2085_v23 = vadd.f32 %v2084_v19, %v2083_v17 }
 0x219   : > { %v1399_v24 = vadd.f32 %v2085_v23, %v3363_v33  ;;  %v1557_v25 = vadd.f32 %v2194_v12, %v1396_v21 }
 0x21b   : > { %v1617_v26 = vmax.f32 %v1557_v25, 0.0  ;;  %v1560_v27 = vadd.f32 %v2197_v20, %v1399_v24 }
 0x21d   : > { %v1662_v28 = vadd.f32 %v1661_v22, %v1617_v26  ;;  %v1618_v29 = vmax.f32 %v1560_v27, 0.0 }
 0x21f   : > { %v1663_v30 = vadd.f32 %v1662_v28, %v1618_v29 }
 0x221   : > { %v1664_v31 = vrot.slane %v1663_v30, 4 }
 0x223   : > { %v1665_v32 = vadd.f32 %v1664_v31, %v1663_v30 }
 0x225   : > { %v1666_v34 = vrot.slane %v1665_v32, 2 }
 0x227   : > { %v1667_v35 = vadd.f32 %v1666_v34, %v1665_v32 }
 0x229   : > { %v1668_v36 = vrot.slane %v1667_v35, 1 }
 0x22b   : > { %v1669_v37 = vadd.f32 %v1668_v36, %v1667_v35 }
 0x22d   : > { %v1670_v38 = vmul.f32 0.015625, %v1669_v37 }
 0x22f   : > { %1671 = vst [vmem:[%s3376_s27 + $0x2] sm:$0x1] %v1670_v38 }
 0x239   : > { %v2198_v39 = vpop.f32.mrb[48].mxu1 }
 0x23a   : > { %v2199_v41 = vpop.f32.mrb[49].mxu1 }
 0x23b   : > { %v2086_v40 = vpop.f32.mrb[48].mxu0  ;;  %v2200_v43 = vadd.f32 %v2199_v41, %v2198_v39  ;;  %v2201_v44 = vpop.f32.mrb[50].mxu1 }
 0x23c   : > { %v2087_v42 = vpop.f32.mrb[49].mxu0  ;;  %v2202_v47 = vpop.f32.mrb[51].mxu1 }
 0x23d   : > { %v2088_v45 = vadd.f32 %v2087_v42, %v2086_v40  ;;  %v2089_v46 = vpop.f32.mrb[50].mxu0  ;;  %v2203_v49 = vadd.f32 %v2202_v47, %v2201_v44 }
 0x23e   : > { %v2090_v48 = vpop.f32.mrb[51].mxu0 }
 0x23f   : > { %v1404_v50 = vadd.f32 %v2088_v45, %v3363_v33  ;;  %v2091_v51 = vadd.f32 %v2090_v48, %v2089_v46 }
 0x241   : > { %v1565_v52 = vadd.f32 %v2200_v43, %v1404_v50  ;;  %v1407_v53 = vadd.f32 %v2091_v51, %v3363_v33  ;;  %v2204_v54 = vpop.f32.mrb[52].mxu1 }
 0x242   : > { %v2205_v57 = vpop.f32.mrb[53].mxu1 }
 0x243   : > { %v1568_v55 = vadd.f32 %v2203_v49, %v1407_v53  ;;  %v2092_v56 = vpop.f32.mrb[52].mxu0  ;;  %v2206_v59 = vadd.f32 %v2205_v57, %v2204_v54  ;;  %v2207_v60 = vpop.f32.mrb[54].mxu1  ;;  %v1619_v61 = vmax.f32 %v1565_v52, 0.0 }
 0x244   : > { %v2093_v58 = vpop.f32.mrb[53].mxu0  ;;  %v2208_v1 = vpop.f32.mrb[55].mxu1 }
 0x245   : > { %v1620_v62 = vmax.f32 %v1568_v55, 0.0  ;;  %v2094_v63 = vadd.f32 %v2093_v58, %v2092_v56  ;;  %v2095_v0 = vpop.f32.mrb[54].mxu0  ;;  %v2209_v3 = vadd.f32 %v2208_v1, %v2207_v60 }
 0x246   : > { %v2096_v2 = vpop.f32.mrb[55].mxu0 }
 0x247   : > { %v1672_v4 = vadd.f32 %v1620_v62, %v1619_v61  ;;  %v1412_v5 = vadd.f32 %v2094_v63, %v3363_v33  ;;  %v2097_v6 = vadd.f32 %v2096_v2, %v2095_v0 }
 0x249   : > { %v1573_v7 = vadd.f32 %v2206_v59, %v1412_v5  ;;  %v1415_v8 = vadd.f32 %v2097_v6, %v3363_v33  ;;  %v2210_v9 = vpop.f32.mrb[56].mxu1 }
 0x24a   : > { %v2211_v13 = vpop.f32.mrb[57].mxu1 }
 0x24b   : > { %v1621_v10 = vmax.f32 %v1573_v7, 0.0  ;;  %v1576_v11 = vadd.f32 %v2209_v3, %v1415_v8  ;;  %v2098_v12 = vpop.f32.mrb[56].mxu0  ;;  %v2212_v15 = vadd.f32 %v2211_v13, %v2210_v9  ;;  %v2213_v16 = vpop.f32.mrb[58].mxu1 }
 0x24c   : > { %v2099_v14 = vpop.f32.mrb[57].mxu0  ;;  %v2214_v21 = vpop.f32.mrb[59].mxu1 }
 0x24d   : > { %v1673_v17 = vadd.f32 %v1672_v4, %v1621_v10  ;;  %v1622_v18 = vmax.f32 %v1576_v11, 0.0  ;;  %v2100_v19 = vadd.f32 %v2099_v14, %v2098_v12  ;;  %v2101_v20 = vpop.f32.mrb[58].mxu0  ;;  %v2215_v23 = vadd.f32 %v2214_v21, %v2213_v16 }
 0x24e   : > { %v2102_v22 = vpop.f32.mrb[59].mxu0 }
 0x24f   : > { %v1674_v24 = vadd.f32 %v1673_v17, %v1622_v18  ;;  %v1420_v25 = vadd.f32 %v2100_v19, %v3363_v33  ;;  %v2103_v26 = vadd.f32 %v2102_v22, %v2101_v20 }
 0x251   : > { %v1581_v27 = vadd.f32 %v2212_v15, %v1420_v25  ;;  %v1423_v28 = vadd.f32 %v2103_v26, %v3363_v33  ;;  %v2216_v29 = vpop.f32.mrb[60].mxu1 }
 0x252   : > { %v2217_v34 = vpop.f32.mrb[61].mxu1 }
 0x253   : > { %v1623_v30 = vmax.f32 %v1581_v27, 0.0  ;;  %v1584_v31 = vadd.f32 %v2215_v23, %v1423_v28  ;;  %v2104_v32 = vpop.f32.mrb[60].mxu0  ;;  %v2218_v36 = vadd.f32 %v2217_v34, %v2216_v29  ;;  %v2219_v37 = vpop.f32.mrb[62].mxu1 }
 0x254   : > { %v2105_v35 = vpop.f32.mrb[61].mxu0  ;;  %v2220_v42 = vpop.f32.mrb[63].mxu1 }
 0x255   : > { %v1675_v38 = vadd.f32 %v1674_v24, %v1623_v30  ;;  %v1624_v39 = vmax.f32 %v1584_v31, 0.0  ;;  %v2106_v40 = vadd.f32 %v2105_v35, %v2104_v32  ;;  %v2107_v41 = vpop.f32.mrb[62].mxu0  ;;  %v2221_v44 = vadd.f32 %v2220_v42, %v2219_v37 }
 0x256   : > { %v2108_v43 = vpop.f32.mrb[63].mxu0 }
 0x257   : > { %v1676_v45 = vadd.f32 %v1675_v38, %v1624_v39  ;;  %v1428_v46 = vadd.f32 %v2106_v40, %v3363_v33  ;;  %v2109_v47 = vadd.f32 %v2108_v43, %v2107_v41 }
 0x259   : > { %v1589_v48 = vadd.f32 %v2218_v36, %v1428_v46  ;;  %v1431_v49 = vadd.f32 %v2109_v47, %v3363_v33 }
 0x25b   : > { %v1625_v50 = vmax.f32 %v1589_v48, 0.0  ;;  %v1592_v51 = vadd.f32 %v2221_v44, %v1431_v49 }
 0x25d   : > { %v1677_v52 = vadd.f32 %v1676_v45, %v1625_v50  ;;  %v1626_v53 = vmax.f32 %v1592_v51, 0.0 }
 0x25f   : > { %v1678_v54 = vadd.f32 %v1677_v52, %v1626_v53 }
 0x261   : > { %v1679_v55 = vrot.slane %v1678_v54, 4 }
 0x263   : > { %v1680_v56 = vadd.f32 %v1679_v55, %v1678_v54 }
 0x265   : > { %v1681_v57 = vrot.slane %v1680_v56, 2 }
 0x267   : > { %v1682_v58 = vadd.f32 %v1681_v57, %v1680_v56 }
 0x269   : > { %v1683_v59 = vrot.slane %v1682_v58, 1 }
 0x26b   : > { %v1684_v60 = vadd.f32 %v1683_v59, %v1682_v58 }
 0x26d   : > { %v1685_v61 = vmul.f32 0.015625, %v1684_v60 }
 0x26f   : > { %1686 = vst [vmem:[%s3376_s27 + $0x3] sm:$0x1] %v1685_v61 }
 0x270   : > { %2882 = shalt.err (!%p2879_p3)
}
 0x271   : > { %s2883_s11 = scalar_lea.hbm %s3410_s6, 64  ;;  %s2887_s20 = scalar_lea.hbm %s3458_s3, 128 }
 0x272   : > { %p2884_p4 = scmp.ne.s32.totalorder %s3410_s6, %s2883_s11  ;;  %p2888_p9 = scmp.lt.u32.totalorder %s3410_s6, %s3458_s3 }
 0x273   : > { %p2889_p10 = scmp.lt.u32.totalorder %s2887_s20, %s2883_s11  ;;  %p2891_p12 = scmp.lt.u32.totalorder %s2883_s11, %s3410_s6 }
 0x274   : > { %p2885_p7 = pnand %p2884_p4, %p2992_p5 }
 0x275   : > { %p2890_p11 = por %p2889_p10, %p2888_p9 }
 0x276   : > { %p2886_p8 = pneg %p2885_p7 }
 0x277   : > { %p2892_p13 = por %p2891_p12, %p2890_p11 }
 0x279   : > { %p2893_p0 = pnand %p2892_p13, %p2886_p8 }
 0x27b   : > { %2896 = shalt.err (!%p2893_p0)
}
 0x27c   : > { %2222 = dma.vmem_to_hbm [thread:$0]  (%p2992_p5), %s3412_s30, 64, %s3410_s6, %s1688_s7  }
 0x27d PF: > { %p2228_p1 = scmp.ge.s32.totalorder %s2931_s15, 2  ;;  %s1713_s25 = sand.u32 1, %s2919_s12  }
 0x27e   : > { %s1714_s26 = scalar_lea.sflag [#allocation3], %s1713_s25 }
 0x27f   : > { %p2225_p2 = pnand %p2228_p1, %p2996_p6 }
 0x281   : > { %2914 = dma.done.wait (!%p2225_p2), %s1714_s26, 64  }
 0x282   : > { %2916 = vsyncadd (!%p2225_p2), %s1714_s26, 4294967232  ;;  %p13_p3 = scmp.ge.s32.totalorder %s2979_s18, 4   ;;  %s3461_s12 = smov %s2923_s13 }
 0x283   : > { %s3462_s13 = smov %s2927_s14  ;;  %s3463_s14 = smov %s2990_s21 }
 0x284   : > { %s3464_s15 = smov %s2979_s18  ;;  %15 = sbr.rel (!%p13_p3) target bundleno = 3 (0x3), region = 70 }
 0x28b   :  { %1719 = vsyncpa [#allocation3], 1 }
 0x28c   :  { %1721 = vsyncpa [#allocation3 + $0x1], 1 }

</bundles_post_ra>
